<compile_context>
chip_gen: v6e
topology: v6e:2x2x1
jax: 0.10.0
libtpu: 0.0.40
codegen_flags: <defaults>
</compile_context>

<pallas_src>
import jax
import jax.numpy as jnp
from jax import lax
from jax.experimental import pallas as pl
from jax.experimental.pallas import tpu as pltpu

# ---------------- problem sizes (small, consistent with the module) ----------
B = 2            # batch
T = 8            # sequence length
H = 32           # hidden_size
V = 40           # vocab_size
O = 16           # output_size
L = 2            # n_layers
O_PAD = 128      # lane-dense logits width (O=16 padded to 128 lanes)
TB = T * B


def _decoder_kernel(ids_ref, emb_proj_ref, w_ih_ref, w_hh_ref, b_ref,
                    w_out_ref, b_out_ref,
                    logits_ref, h_n_ref, c_n_ref):
    """ids: (T*B,1) i32 time-major.
       emb_proj: (V,4H) = embedding @ w_ih[0]   (layer-0 input proj folded in)
       w_ih: (L-1,H,4H) for layers 1..L-1   w_hh: (L,H,4H)   b: (L,1,4H)
       w_out: (H,128) lane-padded            b_out: (1,128) lane-padded
       logits: (T*B,128) time-major          h_n / c_n: (L,B,H)."""
    f32 = jnp.float32

    # ---- layer-0 gate pre-activations for ALL timesteps: one MXU matmul -----
    ids = ids_ref[...]                                            # (T*B, 1)
    onehot = (ids == lax.broadcasted_iota(jnp.int32, (TB, V), 1)).astype(f32)
    pre0 = jnp.dot(onehot, emb_proj_ref[...],
                   preferred_element_type=f32) + b_ref[0]         # (T*B, 4H)

    # lane mask selecting the g-gate lanes [2H, 3H) of the packed [i, f, g, o]
    lane = lax.broadcasted_iota(jnp.int32, (B, 4 * H), 1)
    g_mask = (lane >= 2 * H) & (lane < 3 * H)

    # hoisted weight / bias loads (static indices, once per layer)
    w_hh = [w_hh_ref[l] for l in range(L)]                        # (H, 4H)
    w_ih = [None] + [w_ih_ref[l - 1] for l in range(1, L)]        # (H, 4H)
    bias = [None] + [b_ref[l] for l in range(1, L)]               # (1, 4H)

    def lstm_cell(gates, c_old):
        # full-width activations (2 EUP pushes); g-gate picked by the lane mask
        act = jnp.where(g_mask, jnp.tanh(gates), jax.nn.sigmoid(gates))
        i_g = act[:, 0 * H:1 * H]
        f_g = act[:, 1 * H:2 * H]
        g_g = act[:, 2 * H:3 * H]
        o_g = act[:, 3 * H:4 * H]
        c_new = f_g * c_old + i_g * g_g
        h_new = o_g * jnp.tanh(c_new)
        return h_new, c_new

    zeros = jnp.zeros((B, H), f32)
    h = [zeros] * L                 # per-layer hidden state (values, no scratch)
    c = [zeros] * L                 # per-layer cell state
    outs = []                       # last layer's h_t, collected for bulk store

    # ---- cross-layer wavefront: layer l handles t = w - l.  All reads of h use
    #      the previous-wave snapshot, so the L matmuls per wave are independent.
    for w in range(T + L - 1):      # fully unrolled (static Python loop)
        h_prev = list(h)
        for l in range(L):
            t = w - l
            if 0 <= t < T:
                if l == 0:
                    gates = pre0[t * B:(t + 1) * B, :] + jnp.dot(
                        h_prev[0], w_hh[0], preferred_element_type=f32)
                else:
                    # per-step input-to-hidden dot (off the critical path: its
                    # operand h_prev[l-1] was produced in the previous wave)
                    gates = (jnp.dot(h_prev[l - 1], w_ih[l],
                                     preferred_element_type=f32)
                             + jnp.dot(h_prev[l], w_hh[l],
                                       preferred_element_type=f32)
                             + bias[l])
                h[l], c[l] = lstm_cell(gates, c[l])
                if l == L - 1:
                    outs.append(h[l])

    # ---- one bulk lane-dense output projection + single unmasked store ------
    y = jnp.concatenate(outs, axis=0)                             # (T*B, H)
    logits_ref[...] = (jnp.dot(y, w_out_ref[...],
                               preferred_element_type=f32)
                       + b_out_ref[...])                          # (T*B, 128)
    for l in range(L):
        h_n_ref[l] = h[l]
        c_n_ref[l] = c[l]


def prepare_params(params):
    """One-time parameter preparation (outside the per-call jit path):
       fold embedding into layer-0's input projection and lane-pad the output
       projection to 128."""
    hp = lax.Precision.HIGHEST
    emb_proj = jnp.dot(params["embedding"], params["w_ih"][0],
                       precision=hp)                              # (V, 4H)
    w_out_pad = jnp.zeros((H, O_PAD), jnp.float32).at[:, :O].set(params["w_out"])
    b_out_pad = jnp.zeros((1, O_PAD), jnp.float32).at[:, :O].set(params["b_out"])
    return dict(emb_proj=emb_proj,
                w_ih_rest=params["w_ih"][1:],                     # (L-1, H, 4H)
                w_hh=params["w_hh"], b=params["b"],
                w_out_pad=w_out_pad, b_out_pad=b_out_pad)


def _base_decoder_forward(inputs, prep):
    """inputs: (B, T) int32 token ids. Returns (logits (B,T,O), (h_n, c_n))."""
    ids_tm = jnp.transpose(inputs).reshape(TB, 1).astype(jnp.int32)  # time-major

    vmem = pl.BlockSpec(memory_space=pltpu.MemorySpace.VMEM)
    logits_pad, h_n, c_n = pl.pallas_call(
        _decoder_kernel,
        out_shape=(
            jax.ShapeDtypeStruct((TB, O_PAD), jnp.float32),
            jax.ShapeDtypeStruct((L, B, H), jnp.float32),
            jax.ShapeDtypeStruct((L, B, H), jnp.float32),
        ),
        in_specs=[vmem] * 7,
        out_specs=(vmem, vmem, vmem),
    )(ids_tm, prep["emb_proj"], prep["w_ih_rest"], prep["w_hh"], prep["b"],
      prep["w_out_pad"], prep["b_out_pad"])

    # back to PyTorch batch_first + drop the lane padding
    logits = jnp.transpose(logits_pad.reshape(T, B, O_PAD)[:, :, :O], (1, 0, 2))
    return logits, (h_n, c_n)


base_decoder_forward = jax.jit(_base_decoder_forward)


# ---------------- pure-JAX reference (for correctness check) ----------------
def reference_forward(inputs, params):
    hp = lax.Precision.HIGHEST
    emb = jnp.take(params["embedding"], inputs, axis=0)           # (B, T, H)
    layer_in = jnp.transpose(emb, (1, 0, 2))                      # (T, B, H)
    h_fins, c_fins = [], []
    for layer in range(L):
        w_ih = params["w_ih"][layer]
        w_hh = params["w_hh"][layer]
        bias = params["b"][layer, 0]

        def step(carry, xt, w_ih=w_ih, w_hh=w_hh, bias=bias):
            h, c = carry
            g = (jnp.dot(xt, w_ih, precision=hp)
                 + jnp.dot(h, w_hh, precision=hp) + bias)
            i_g = jax.nn.sigmoid(g[:, :H])
            f_g = jax.nn.sigmoid(g[:, H:2 * H])
            g_g = jnp.tanh(g[:, 2 * H:3 * H])
            o_g = jax.nn.sigmoid(g[:, 3 * H:])
            c2 = f_g * c + i_g * g_g
            h2 = o_g * jnp.tanh(c2)
            return (h2, c2), h2

        (hf, cf), ys = lax.scan(step,
                                (jnp.zeros((B, H), jnp.float32),
                                 jnp.zeros((B, H), jnp.float32)),
                                layer_in)
        layer_in = ys
        h_fins.append(hf)
        c_fins.append(cf)
    logits = jnp.dot(layer_in, params["w_out"], precision=hp) + params["b_out"][0]
    return jnp.transpose(logits, (1, 0, 2)), (jnp.stack(h_fins), jnp.stack(c_fins))


def init_params(key):
    ks = jax.random.split(key, 6)
    embedding = 0.1 * jax.random.normal(ks[0], (V, H), jnp.float32)
    embedding = embedding.at[0].set(0.0)                          # padding_idx=0
    # PyTorch stores weight_ih as (4H, in); we store the transpose (in=H, 4H).
    w_ih = 0.1 * jax.random.normal(ks[1], (L, H, 4 * H), jnp.float32)
    w_hh = 0.1 * jax.random.normal(ks[2], (L, H, 4 * H), jnp.float32)
    b = 0.1 * jax.random.normal(ks[3], (L, 1, 4 * H), jnp.float32)   # b_ih + b_hh
    w_out = 0.1 * jax.random.normal(ks[4], (H, O), jnp.float32)      # Linear W^T
    b_out = 0.1 * jax.random.normal(ks[5], (1, O), jnp.float32)
    return dict(embedding=embedding, w_ih=w_ih, w_hh=w_hh, b=b,
                w_out=w_out, b_out=b_out)


if __name__ == "__main__":
    key = jax.random.PRNGKey(0)
    pkey, ikey = jax.random.split(key)
    params = init_params(pkey)
    prep = prepare_params(params)                                  # one-time prep
    inputs = jax.random.randint(ikey, (B, T), 0, V, dtype=jnp.int32)

    logits, (h_n, c_n) = base_decoder_forward(inputs, prep)
    jax.block_until_ready((logits, h_n, c_n))

    ref_logits, (ref_h, ref_c) = reference_forward(inputs, params)
    assert logits.shape == (B, T, O)
    assert h_n.shape == (L, B, H) and c_n.shape == (L, B, H)
    # 1e-3 tolerance: kernel uses the Mosaic f32 MXU path, the reference uses
    # XLA HIGHEST-precision matmuls; residual differences are ~1e-6 while any
    # real wiring/gate-order bug would be O(0.1).
    assert jnp.allclose(logits, ref_logits, atol=1e-3, rtol=1e-3)
    assert jnp.allclose(h_n, ref_h, atol=1e-3, rtol=1e-3)
    assert jnp.allclose(c_n, ref_c, atol=1e-3, rtol=1e-3)

    print("KERNEL_OK")
</pallas_src>

<mosaic_0001>
module attributes {stable_mosaic.version = 11 : i64} {
  func.func @_decoder_kernel(%arg0: memref<16x1xi32, #tpu.memory_space<vmem>>, %arg1: memref<40x128xf32, #tpu.memory_space<vmem>>, %arg2: memref<1x32x128xf32, #tpu.memory_space<vmem>>, %arg3: memref<2x32x128xf32, #tpu.memory_space<vmem>>, %arg4: memref<2x1x128xf32, #tpu.memory_space<vmem>>, %arg5: memref<32x128xf32, #tpu.memory_space<vmem>>, %arg6: memref<1x128xf32, #tpu.memory_space<vmem>>, %arg7: memref<16x128xf32, #tpu.memory_space<vmem>>, %arg8: memref<2x2x32xf32, #tpu.memory_space<vmem>>, %arg9: memref<2x2x32xf32, #tpu.memory_space<vmem>>) attributes {dimension_semantics = [], scalar_prefetch = 0 : i64, scratch_operands = 0 : i64, tpu.core_type = #tpu.core_type<tc>} {
    %c0 = arith.constant 0 : index
    %c0_0 = arith.constant 0 : index
    %0 = vector.load %arg0[%c0, %c0_0] : memref<16x1xi32, #tpu.memory_space<vmem>>, vector<16x1xi32>
    %1 = tpu.iota {dimensions = array<i32: 1>} : vector<16x40xi32>
    %2 = vector.broadcast %0 : vector<16x1xi32> to vector<16x40xi32>
    %3 = arith.cmpi eq, %2, %1 : vector<16x40xi32>
    %4 = arith.extui %3 : vector<16x40xi1> to vector<16x40xi32>
    %5 = arith.sitofp %4 : vector<16x40xi32> to vector<16x40xf32>
    %c0_1 = arith.constant 0 : index
    %c0_2 = arith.constant 0 : index
    %6 = vector.load %arg1[%c0_1, %c0_2] : memref<40x128xf32, #tpu.memory_space<vmem>>, vector<40x128xf32>
    %cst = arith.constant dense<0.000000e+00> : vector<16x128xf32>
    %7 = tpu.matmul %5, %6, %cst {dimension_numbers = #tpu.dot_dimension_numbers<[1], [0], [0], [1], [0, 0, 1, 1], [], []>} : vector<16x40xf32>, vector<40x128xf32>, vector<16x128xf32> -> vector<16x128xf32>
    %c0_3 = arith.constant 0 : index
    %c0_4 = arith.constant 0 : index
    %c0_5 = arith.constant 0 : index
    %8 = vector.load %arg4[%c0_3, %c0_4, %c0_5] : memref<2x1x128xf32, #tpu.memory_space<vmem>>, vector<1x1x128xf32>
    %9 = vector.shape_cast %8 : vector<1x1x128xf32> to vector<1x128xf32>
    %10 = vector.broadcast %9 : vector<1x128xf32> to vector<16x128xf32>
    %11 = arith.addf %7, %10 : vector<16x128xf32>
    %12 = tpu.iota {dimensions = array<i32: 1>} : vector<2x128xi32>
    %c64_i32 = arith.constant 64 : i32
    %13 = vector.broadcast %c64_i32 : i32 to vector<2x128xi32>
    %14 = arith.cmpi sge, %12, %13 : vector<2x128xi32>
    %c96_i32 = arith.constant 96 : i32
    %15 = vector.broadcast %c96_i32 : i32 to vector<2x128xi32>
    %16 = arith.cmpi slt, %12, %15 : vector<2x128xi32>
    %17 = arith.andi %14, %16 : vector<2x128xi1>
    %c0_6 = arith.constant 0 : index
    %c0_7 = arith.constant 0 : index
    %c0_8 = arith.constant 0 : index
    %18 = vector.load %arg3[%c0_6, %c0_7, %c0_8] : memref<2x32x128xf32, #tpu.memory_space<vmem>>, vector<1x32x128xf32>
    %19 = vector.shape_cast %18 : vector<1x32x128xf32> to vector<32x128xf32>
    %c1 = arith.constant 1 : index
    %c0_9 = arith.constant 0 : index
    %c0_10 = arith.constant 0 : index
    %20 = vector.load %arg3[%c1, %c0_9, %c0_10] : memref<2x32x128xf32, #tpu.memory_space<vmem>>, vector<1x32x128xf32>
    %21 = vector.shape_cast %20 : vector<1x32x128xf32> to vector<32x128xf32>
    %c0_11 = arith.constant 0 : index
    %c0_12 = arith.constant 0 : index
    %c0_13 = arith.constant 0 : index
    %22 = vector.load %arg2[%c0_11, %c0_12, %c0_13] : memref<1x32x128xf32, #tpu.memory_space<vmem>>, vector<1x32x128xf32>
    %23 = vector.shape_cast %22 : vector<1x32x128xf32> to vector<32x128xf32>
    %c1_14 = arith.constant 1 : index
    %c0_15 = arith.constant 0 : index
    %c0_16 = arith.constant 0 : index
    %24 = vector.load %arg4[%c1_14, %c0_15, %c0_16] : memref<2x1x128xf32, #tpu.memory_space<vmem>>, vector<1x1x128xf32>
    %25 = vector.shape_cast %24 : vector<1x1x128xf32> to vector<1x128xf32>
    %cst_17 = arith.constant 0.000000e+00 : f32
    %26 = vector.broadcast %cst_17 : f32 to vector<2x32xf32>
    %27 = vector.extract_strided_slice %11 {offsets = [0, 0], sizes = [2, 128], strides = [1, 1]} : vector<16x128xf32> to vector<2x128xf32>
    %cst_18 = arith.constant dense<0.000000e+00> : vector<2x128xf32>
    %28 = tpu.matmul %26, %19, %cst_18 {dimension_numbers = #tpu.dot_dimension_numbers<[1], [0], [0], [1], [0, 0, 1, 1], [], []>} : vector<2x32xf32>, vector<32x128xf32>, vector<2x128xf32> -> vector<2x128xf32>
    %29 = arith.addf %27, %28 : vector<2x128xf32>
    %30 = math.tanh %29 : vector<2x128xf32>
    %31 = arith.negf %29 : vector<2x128xf32>
    %32 = math.exp %31 : vector<2x128xf32>
    %cst_19 = arith.constant 1.000000e+00 : f32
    %33 = vector.broadcast %cst_19 : f32 to vector<2x128xf32>
    %34 = arith.addf %33, %32 : vector<2x128xf32>
    %35 = arith.divf %33, %34 : vector<2x128xf32>
    %36 = arith.select %17, %30, %35 : vector<2x128xi1>, vector<2x128xf32>
    %37 = vector.extract_strided_slice %36 {offsets = [0, 0], sizes = [2, 32], strides = [1, 1]} : vector<2x128xf32> to vector<2x32xf32>
    %38 = vector.extract_strided_slice %36 {offsets = [0, 32], sizes = [2, 32], strides = [1, 1]} : vector<2x128xf32> to vector<2x32xf32>
    %39 = vector.extract_strided_slice %36 {offsets = [0, 64], sizes = [2, 32], strides = [1, 1]} : vector<2x128xf32> to vector<2x32xf32>
    %40 = vector.extract_strided_slice %36 {offsets = [0, 96], sizes = [2, 32], strides = [1, 1]} : vector<2x128xf32> to vector<2x32xf32>
    %41 = arith.mulf %38, %26 : vector<2x32xf32>
    %42 = arith.mulf %37, %39 : vector<2x32xf32>
    %43 = arith.addf %41, %42 : vector<2x32xf32>
    %44 = math.tanh %43 : vector<2x32xf32>
    %45 = arith.mulf %40, %44 : vector<2x32xf32>
    %46 = vector.extract_strided_slice %11 {offsets = [2, 0], sizes = [2, 128], strides = [1, 1]} : vector<16x128xf32> to vector<2x128xf32>
    %cst_20 = arith.constant dense<0.000000e+00> : vector<2x128xf32>
    %47 = tpu.matmul %45, %19, %cst_20 {dimension_numbers = #tpu.dot_dimension_numbers<[1], [0], [0], [1], [0, 0, 1, 1], [], []>} : vector<2x32xf32>, vector<32x128xf32>, vector<2x128xf32> -> vector<2x128xf32>
    %48 = arith.addf %46, %47 : vector<2x128xf32>
    %49 = math.tanh %48 : vector<2x128xf32>
    %50 = arith.negf %48 : vector<2x128xf32>
    %51 = math.exp %50 : vector<2x128xf32>
    %cst_21 = arith.constant 1.000000e+00 : f32
    %52 = vector.broadcast %cst_21 : f32 to vector<2x128xf32>
    %53 = arith.addf %52, %51 : vector<2x128xf32>
    %54 = arith.divf %52, %53 : vector<2x128xf32>
    %55 = arith.select %17, %49, %54 : vector<2x128xi1>, vector<2x128xf32>
    %56 = vector.extract_strided_slice %55 {offsets = [0, 0], sizes = [2, 32], strides = [1, 1]} : vector<2x128xf32> to vector<2x32xf32>
    %57 = vector.extract_strided_slice %55 {offsets = [0, 32], sizes = [2, 32], strides = [1, 1]} : vector<2x128xf32> to vector<2x32xf32>
    %58 = vector.extract_strided_slice %55 {offsets = [0, 64], sizes = [2, 32], strides = [1, 1]} : vector<2x128xf32> to vector<2x32xf32>
    %59 = vector.extract_strided_slice %55 {offsets = [0, 96], sizes = [2, 32], strides = [1, 1]} : vector<2x128xf32> to vector<2x32xf32>
    %60 = arith.mulf %57, %43 : vector<2x32xf32>
    %61 = arith.mulf %56, %58 : vector<2x32xf32>
    %62 = arith.addf %60, %61 : vector<2x32xf32>
    %63 = math.tanh %62 : vector<2x32xf32>
    %64 = arith.mulf %59, %63 : vector<2x32xf32>
    %cst_22 = arith.constant dense<0.000000e+00> : vector<2x128xf32>
    %65 = tpu.matmul %45, %23, %cst_22 {dimension_numbers = #tpu.dot_dimension_numbers<[1], [0], [0], [1], [0, 0, 1, 1], [], []>} : vector<2x32xf32>, vector<32x128xf32>, vector<2x128xf32> -> vector<2x128xf32>
    %cst_23 = arith.constant dense<0.000000e+00> : vector<2x128xf32>
    %66 = tpu.matmul %26, %21, %cst_23 {dimension_numbers = #tpu.dot_dimension_numbers<[1], [0], [0], [1], [0, 0, 1, 1], [], []>} : vector<2x32xf32>, vector<32x128xf32>, vector<2x128xf32> -> vector<2x128xf32>
    %67 = arith.addf %65, %66 : vector<2x128xf32>
    %68 = vector.broadcast %25 : vector<1x128xf32> to vector<2x128xf32>
    %69 = arith.addf %67, %68 : vector<2x128xf32>
    %70 = math.tanh %69 : vector<2x128xf32>
    %71 = arith.negf %69 : vector<2x128xf32>
    %72 = math.exp %71 : vector<2x128xf32>
    %cst_24 = arith.constant 1.000000e+00 : f32
    %73 = vector.broadcast %cst_24 : f32 to vector<2x128xf32>
    %74 = arith.addf %73, %72 : vector<2x128xf32>
    %75 = arith.divf %73, %74 : vector<2x128xf32>
    %76 = arith.select %17, %70, %75 : vector<2x128xi1>, vector<2x128xf32>
    %77 = vector.extract_strided_slice %76 {offsets = [0, 0], sizes = [2, 32], strides = [1, 1]} : vector<2x128xf32> to vector<2x32xf32>
    %78 = vector.extract_strided_slice %76 {offsets = [0, 32], sizes = [2, 32], strides = [1, 1]} : vector<2x128xf32> to vector<2x32xf32>
    %79 = vector.extract_strided_slice %76 {offsets = [0, 64], sizes = [2, 32], strides = [1, 1]} : vector<2x128xf32> to vector<2x32xf32>
    %80 = vector.extract_strided_slice %76 {offsets = [0, 96], sizes = [2, 32], strides = [1, 1]} : vector<2x128xf32> to vector<2x32xf32>
    %81 = arith.mulf %78, %26 : vector<2x32xf32>
    %82 = arith.mulf %77, %79 : vector<2x32xf32>
    %83 = arith.addf %81, %82 : vector<2x32xf32>
    %84 = math.tanh %83 : vector<2x32xf32>
    %85 = arith.mulf %80, %84 : vector<2x32xf32>
    %86 = vector.extract_strided_slice %11 {offsets = [4, 0], sizes = [2, 128], strides = [1, 1]} : vector<16x128xf32> to vector<2x128xf32>
    %cst_25 = arith.constant dense<0.000000e+00> : vector<2x128xf32>
    %87 = tpu.matmul %64, %19, %cst_25 {dimension_numbers = #tpu.dot_dimension_numbers<[1], [0], [0], [1], [0, 0, 1, 1], [], []>} : vector<2x32xf32>, vector<32x128xf32>, vector<2x128xf32> -> vector<2x128xf32>
    %88 = arith.addf %86, %87 : vector<2x128xf32>
    %89 = math.tanh %88 : vector<2x128xf32>
    %90 = arith.negf %88 : vector<2x128xf32>
    %91 = math.exp %90 : vector<2x128xf32>
    %cst_26 = arith.constant 1.000000e+00 : f32
    %92 = vector.broadcast %cst_26 : f32 to vector<2x128xf32>
    %93 = arith.addf %92, %91 : vector<2x128xf32>
    %94 = arith.divf %92, %93 : vector<2x128xf32>
    %95 = arith.select %17, %89, %94 : vector<2x128xi1>, vector<2x128xf32>
    %96 = vector.extract_strided_slice %95 {offsets = [0, 0], sizes = [2, 32], strides = [1, 1]} : vector<2x128xf32> to vector<2x32xf32>
    %97 = vector.extract_strided_slice %95 {offsets = [0, 32], sizes = [2, 32], strides = [1, 1]} : vector<2x128xf32> to vector<2x32xf32>
    %98 = vector.extract_strided_slice %95 {offsets = [0, 64], sizes = [2, 32], strides = [1, 1]} : vector<2x128xf32> to vector<2x32xf32>
    %99 = vector.extract_strided_slice %95 {offsets = [0, 96], sizes = [2, 32], strides = [1, 1]} : vector<2x128xf32> to vector<2x32xf32>
    %100 = arith.mulf %97, %62 : vector<2x32xf32>
    %101 = arith.mulf %96, %98 : vector<2x32xf32>
    %102 = arith.addf %100, %101 : vector<2x32xf32>
    %103 = math.tanh %102 : vector<2x32xf32>
    %104 = arith.mulf %99, %103 : vector<2x32xf32>
    %cst_27 = arith.constant dense<0.000000e+00> : vector<2x128xf32>
    %105 = tpu.matmul %64, %23, %cst_27 {dimension_numbers = #tpu.dot_dimension_numbers<[1], [0], [0], [1], [0, 0, 1, 1], [], []>} : vector<2x32xf32>, vector<32x128xf32>, vector<2x128xf32> -> vector<2x128xf32>
    %cst_28 = arith.constant dense<0.000000e+00> : vector<2x128xf32>
    %106 = tpu.matmul %85, %21, %cst_28 {dimension_numbers = #tpu.dot_dimension_numbers<[1], [0], [0], [1], [0, 0, 1, 1], [], []>} : vector<2x32xf32>, vector<32x128xf32>, vector<2x128xf32> -> vector<2x128xf32>
    %107 = arith.addf %105, %106 : vector<2x128xf32>
    %108 = vector.broadcast %25 : vector<1x128xf32> to vector<2x128xf32>
    %109 = arith.addf %107, %108 : vector<2x128xf32>
    %110 = math.tanh %109 : vector<2x128xf32>
    %111 = arith.negf %109 : vector<2x128xf32>
    %112 = math.exp %111 : vector<2x128xf32>
    %cst_29 = arith.constant 1.000000e+00 : f32
    %113 = vector.broadcast %cst_29 : f32 to vector<2x128xf32>
    %114 = arith.addf %113, %112 : vector<2x128xf32>
    %115 = arith.divf %113, %114 : vector<2x128xf32>
    %116 = arith.select %17, %110, %115 : vector<2x128xi1>, vector<2x128xf32>
    %117 = vector.extract_strided_slice %116 {offsets = [0, 0], sizes = [2, 32], strides = [1, 1]} : vector<2x128xf32> to vector<2x32xf32>
    %118 = vector.extract_strided_slice %116 {offsets = [0, 32], sizes = [2, 32], strides = [1, 1]} : vector<2x128xf32> to vector<2x32xf32>
    %119 = vector.extract_strided_slice %116 {offsets = [0, 64], sizes = [2, 32], strides = [1, 1]} : vector<2x128xf32> to vector<2x32xf32>
    %120 = vector.extract_strided_slice %116 {offsets = [0, 96], sizes = [2, 32], strides = [1, 1]} : vector<2x128xf32> to vector<2x32xf32>
    %121 = arith.mulf %118, %83 : vector<2x32xf32>
    %122 = arith.mulf %117, %119 : vector<2x32xf32>
    %123 = arith.addf %121, %122 : vector<2x32xf32>
    %124 = math.tanh %123 : vector<2x32xf32>
    %125 = arith.mulf %120, %124 : vector<2x32xf32>
    %126 = vector.extract_strided_slice %11 {offsets = [6, 0], sizes = [2, 128], strides = [1, 1]} : vector<16x128xf32> to vector<2x128xf32>
    %cst_30 = arith.constant dense<0.000000e+00> : vector<2x128xf32>
    %127 = tpu.matmul %104, %19, %cst_30 {dimension_numbers = #tpu.dot_dimension_numbers<[1], [0], [0], [1], [0, 0, 1, 1], [], []>} : vector<2x32xf32>, vector<32x128xf32>, vector<2x128xf32> -> vector<2x128xf32>
    %128 = arith.addf %126, %127 : vector<2x128xf32>
    %129 = math.tanh %128 : vector<2x128xf32>
    %130 = arith.negf %128 : vector<2x128xf32>
    %131 = math.exp %130 : vector<2x128xf32>
    %cst_31 = arith.constant 1.000000e+00 : f32
    %132 = vector.broadcast %cst_31 : f32 to vector<2x128xf32>
    %133 = arith.addf %132, %131 : vector<2x128xf32>
    %134 = arith.divf %132, %133 : vector<2x128xf32>
    %135 = arith.select %17, %129, %134 : vector<2x128xi1>, vector<2x128xf32>
    %136 = vector.extract_strided_slice %135 {offsets = [0, 0], sizes = [2, 32], strides = [1, 1]} : vector<2x128xf32> to vector<2x32xf32>
    %137 = vector.extract_strided_slice %135 {offsets = [0, 32], sizes = [2, 32], strides = [1, 1]} : vector<2x128xf32> to vector<2x32xf32>
    %138 = vector.extract_strided_slice %135 {offsets = [0, 64], sizes = [2, 32], strides = [1, 1]} : vector<2x128xf32> to vector<2x32xf32>
    %139 = vector.extract_strided_slice %135 {offsets = [0, 96], sizes = [2, 32], strides = [1, 1]} : vector<2x128xf32> to vector<2x32xf32>
    %140 = arith.mulf %137, %102 : vector<2x32xf32>
    %141 = arith.mulf %136, %138 : vector<2x32xf32>
    %142 = arith.addf %140, %141 : vector<2x32xf32>
    %143 = math.tanh %142 : vector<2x32xf32>
    %144 = arith.mulf %139, %143 : vector<2x32xf32>
    %cst_32 = arith.constant dense<0.000000e+00> : vector<2x128xf32>
    %145 = tpu.matmul %104, %23, %cst_32 {dimension_numbers = #tpu.dot_dimension_numbers<[1], [0], [0], [1], [0, 0, 1, 1], [], []>} : vector<2x32xf32>, vector<32x128xf32>, vector<2x128xf32> -> vector<2x128xf32>
    %cst_33 = arith.constant dense<0.000000e+00> : vector<2x128xf32>
    %146 = tpu.matmul %125, %21, %cst_33 {dimension_numbers = #tpu.dot_dimension_numbers<[1], [0], [0], [1], [0, 0, 1, 1], [], []>} : vector<2x32xf32>, vector<32x128xf32>, vector<2x128xf32> -> vector<2x128xf32>
    %147 = arith.addf %145, %146 : vector<2x128xf32>
    %148 = vector.broadcast %25 : vector<1x128xf32> to vector<2x128xf32>
    %149 = arith.addf %147, %148 : vector<2x128xf32>
    %150 = math.tanh %149 : vector<2x128xf32>
    %151 = arith.negf %149 : vector<2x128xf32>
    %152 = math.exp %151 : vector<2x128xf32>
    %cst_34 = arith.constant 1.000000e+00 : f32
    %153 = vector.broadcast %cst_34 : f32 to vector<2x128xf32>
    %154 = arith.addf %153, %152 : vector<2x128xf32>
    %155 = arith.divf %153, %154 : vector<2x128xf32>
    %156 = arith.select %17, %150, %155 : vector<2x128xi1>, vector<2x128xf32>
    %157 = vector.extract_strided_slice %156 {offsets = [0, 0], sizes = [2, 32], strides = [1, 1]} : vector<2x128xf32> to vector<2x32xf32>
    %158 = vector.extract_strided_slice %156 {offsets = [0, 32], sizes = [2, 32], strides = [1, 1]} : vector<2x128xf32> to vector<2x32xf32>
    %159 = vector.extract_strided_slice %156 {offsets = [0, 64], sizes = [2, 32], strides = [1, 1]} : vector<2x128xf32> to vector<2x32xf32>
    %160 = vector.extract_strided_slice %156 {offsets = [0, 96], sizes = [2, 32], strides = [1, 1]} : vector<2x128xf32> to vector<2x32xf32>
    %161 = arith.mulf %158, %123 : vector<2x32xf32>
    %162 = arith.mulf %157, %159 : vector<2x32xf32>
    %163 = arith.addf %161, %162 : vector<2x32xf32>
    %164 = math.tanh %163 : vector<2x32xf32>
    %165 = arith.mulf %160, %164 : vector<2x32xf32>
    %166 = vector.extract_strided_slice %11 {offsets = [8, 0], sizes = [2, 128], strides = [1, 1]} : vector<16x128xf32> to vector<2x128xf32>
    %cst_35 = arith.constant dense<0.000000e+00> : vector<2x128xf32>
    %167 = tpu.matmul %144, %19, %cst_35 {dimension_numbers = #tpu.dot_dimension_numbers<[1], [0], [0], [1], [0, 0, 1, 1], [], []>} : vector<2x32xf32>, vector<32x128xf32>, vector<2x128xf32> -> vector<2x128xf32>
    %168 = arith.addf %166, %167 : vector<2x128xf32>
    %169 = math.tanh %168 : vector<2x128xf32>
    %170 = arith.negf %168 : vector<2x128xf32>
    %171 = math.exp %170 : vector<2x128xf32>
    %cst_36 = arith.constant 1.000000e+00 : f32
    %172 = vector.broadcast %cst_36 : f32 to vector<2x128xf32>
    %173 = arith.addf %172, %171 : vector<2x128xf32>
    %174 = arith.divf %172, %173 : vector<2x128xf32>
    %175 = arith.select %17, %169, %174 : vector<2x128xi1>, vector<2x128xf32>
    %176 = vector.extract_strided_slice %175 {offsets = [0, 0], sizes = [2, 32], strides = [1, 1]} : vector<2x128xf32> to vector<2x32xf32>
    %177 = vector.extract_strided_slice %175 {offsets = [0, 32], sizes = [2, 32], strides = [1, 1]} : vector<2x128xf32> to vector<2x32xf32>
    %178 = vector.extract_strided_slice %175 {offsets = [0, 64], sizes = [2, 32], strides = [1, 1]} : vector<2x128xf32> to vector<2x32xf32>
    %179 = vector.extract_strided_slice %175 {offsets = [0, 96], sizes = [2, 32], strides = [1, 1]} : vector<2x128xf32> to vector<2x32xf32>
    %180 = arith.mulf %177, %142 : vector<2x32xf32>
    %181 = arith.mulf %176, %178 : vector<2x32xf32>
    %182 = arith.addf %180, %181 : vector<2x32xf32>
    %183 = math.tanh %182 : vector<2x32xf32>
    %184 = arith.mulf %179, %183 : vector<2x32xf32>
    %cst_37 = arith.constant dense<0.000000e+00> : vector<2x128xf32>
    %185 = tpu.matmul %144, %23, %cst_37 {dimension_numbers = #tpu.dot_dimension_numbers<[1], [0], [0], [1], [0, 0, 1, 1], [], []>} : vector<2x32xf32>, vector<32x128xf32>, vector<2x128xf32> -> vector<2x128xf32>
    %cst_38 = arith.constant dense<0.000000e+00> : vector<2x128xf32>
    %186 = tpu.matmul %165, %21, %cst_38 {dimension_numbers = #tpu.dot_dimension_numbers<[1], [0], [0], [1], [0, 0, 1, 1], [], []>} : vector<2x32xf32>, vector<32x128xf32>, vector<2x128xf32> -> vector<2x128xf32>
    %187 = arith.addf %185, %186 : vector<2x128xf32>
    %188 = vector.broadcast %25 : vector<1x128xf32> to vector<2x128xf32>
    %189 = arith.addf %187, %188 : vector<2x128xf32>
    %190 = math.tanh %189 : vector<2x128xf32>
    %191 = arith.negf %189 : vector<2x128xf32>
    %192 = math.exp %191 : vector<2x128xf32>
    %cst_39 = arith.constant 1.000000e+00 : f32
    %193 = vector.broadcast %cst_39 : f32 to vector<2x128xf32>
    %194 = arith.addf %193, %192 : vector<2x128xf32>
    %195 = arith.divf %193, %194 : vector<2x128xf32>
    %196 = arith.select %17, %190, %195 : vector<2x128xi1>, vector<2x128xf32>
    %197 = vector.extract_strided_slice %196 {offsets = [0, 0], sizes = [2, 32], strides = [1, 1]} : vector<2x128xf32> to vector<2x32xf32>
    %198 = vector.extract_strided_slice %196 {offsets = [0, 32], sizes = [2, 32], strides = [1, 1]} : vector<2x128xf32> to vector<2x32xf32>
    %199 = vector.extract_strided_slice %196 {offsets = [0, 64], sizes = [2, 32], strides = [1, 1]} : vector<2x128xf32> to vector<2x32xf32>
    %200 = vector.extract_strided_slice %196 {offsets = [0, 96], sizes = [2, 32], strides = [1, 1]} : vector<2x128xf32> to vector<2x32xf32>
    %201 = arith.mulf %198, %163 : vector<2x32xf32>
    %202 = arith.mulf %197, %199 : vector<2x32xf32>
    %203 = arith.addf %201, %202 : vector<2x32xf32>
    %204 = math.tanh %203 : vector<2x32xf32>
    %205 = arith.mulf %200, %204 : vector<2x32xf32>
    %206 = vector.extract_strided_slice %11 {offsets = [10, 0], sizes = [2, 128], strides = [1, 1]} : vector<16x128xf32> to vector<2x128xf32>
    %cst_40 = arith.constant dense<0.000000e+00> : vector<2x128xf32>
    %207 = tpu.matmul %184, %19, %cst_40 {dimension_numbers = #tpu.dot_dimension_numbers<[1], [0], [0], [1], [0, 0, 1, 1], [], []>} : vector<2x32xf32>, vector<32x128xf32>, vector<2x128xf32> -> vector<2x128xf32>
    %208 = arith.addf %206, %207 : vector<2x128xf32>
    %209 = math.tanh %208 : vector<2x128xf32>
    %210 = arith.negf %208 : vector<2x128xf32>
    %211 = math.exp %210 : vector<2x128xf32>
    %cst_41 = arith.constant 1.000000e+00 : f32
    %212 = vector.broadcast %cst_41 : f32 to vector<2x128xf32>
    %213 = arith.addf %212, %211 : vector<2x128xf32>
    %214 = arith.divf %212, %213 : vector<2x128xf32>
    %215 = arith.select %17, %209, %214 : vector<2x128xi1>, vector<2x128xf32>
    %216 = vector.extract_strided_slice %215 {offsets = [0, 0], sizes = [2, 32], strides = [1, 1]} : vector<2x128xf32> to vector<2x32xf32>
    %217 = vector.extract_strided_slice %215 {offsets = [0, 32], sizes = [2, 32], strides = [1, 1]} : vector<2x128xf32> to vector<2x32xf32>
    %218 = vector.extract_strided_slice %215 {offsets = [0, 64], sizes = [2, 32], strides = [1, 1]} : vector<2x128xf32> to vector<2x32xf32>
    %219 = vector.extract_strided_slice %215 {offsets = [0, 96], sizes = [2, 32], strides = [1, 1]} : vector<2x128xf32> to vector<2x32xf32>
    %220 = arith.mulf %217, %182 : vector<2x32xf32>
    %221 = arith.mulf %216, %218 : vector<2x32xf32>
    %222 = arith.addf %220, %221 : vector<2x32xf32>
    %223 = math.tanh %222 : vector<2x32xf32>
    %224 = arith.mulf %219, %223 : vector<2x32xf32>
    %cst_42 = arith.constant dense<0.000000e+00> : vector<2x128xf32>
    %225 = tpu.matmul %184, %23, %cst_42 {dimension_numbers = #tpu.dot_dimension_numbers<[1], [0], [0], [1], [0, 0, 1, 1], [], []>} : vector<2x32xf32>, vector<32x128xf32>, vector<2x128xf32> -> vector<2x128xf32>
    %cst_43 = arith.constant dense<0.000000e+00> : vector<2x128xf32>
    %226 = tpu.matmul %205, %21, %cst_43 {dimension_numbers = #tpu.dot_dimension_numbers<[1], [0], [0], [1], [0, 0, 1, 1], [], []>} : vector<2x32xf32>, vector<32x128xf32>, vector<2x128xf32> -> vector<2x128xf32>
    %227 = arith.addf %225, %226 : vector<2x128xf32>
    %228 = vector.broadcast %25 : vector<1x128xf32> to vector<2x128xf32>
    %229 = arith.addf %227, %228 : vector<2x128xf32>
    %230 = math.tanh %229 : vector<2x128xf32>
    %231 = arith.negf %229 : vector<2x128xf32>
    %232 = math.exp %231 : vector<2x128xf32>
    %cst_44 = arith.constant 1.000000e+00 : f32
    %233 = vector.broadcast %cst_44 : f32 to vector<2x128xf32>
    %234 = arith.addf %233, %232 : vector<2x128xf32>
    %235 = arith.divf %233, %234 : vector<2x128xf32>
    %236 = arith.select %17, %230, %235 : vector<2x128xi1>, vector<2x128xf32>
    %237 = vector.extract_strided_slice %236 {offsets = [0, 0], sizes = [2, 32], strides = [1, 1]} : vector<2x128xf32> to vector<2x32xf32>
    %238 = vector.extract_strided_slice %236 {offsets = [0, 32], sizes = [2, 32], strides = [1, 1]} : vector<2x128xf32> to vector<2x32xf32>
    %239 = vector.extract_strided_slice %236 {offsets = [0, 64], sizes = [2, 32], strides = [1, 1]} : vector<2x128xf32> to vector<2x32xf32>
    %240 = vector.extract_strided_slice %236 {offsets = [0, 96], sizes = [2, 32], strides = [1, 1]} : vector<2x128xf32> to vector<2x32xf32>
    %241 = arith.mulf %238, %203 : vector<2x32xf32>
    %242 = arith.mulf %237, %239 : vector<2x32xf32>
    %243 = arith.addf %241, %242 : vector<2x32xf32>
    %244 = math.tanh %243 : vector<2x32xf32>
    %245 = arith.mulf %240, %244 : vector<2x32xf32>
    %246 = vector.extract_strided_slice %11 {offsets = [12, 0], sizes = [2, 128], strides = [1, 1]} : vector<16x128xf32> to vector<2x128xf32>
    %cst_45 = arith.constant dense<0.000000e+00> : vector<2x128xf32>
    %247 = tpu.matmul %224, %19, %cst_45 {dimension_numbers = #tpu.dot_dimension_numbers<[1], [0], [0], [1], [0, 0, 1, 1], [], []>} : vector<2x32xf32>, vector<32x128xf32>, vector<2x128xf32> -> vector<2x128xf32>
    %248 = arith.addf %246, %247 : vector<2x128xf32>
    %249 = math.tanh %248 : vector<2x128xf32>
    %250 = arith.negf %248 : vector<2x128xf32>
    %251 = math.exp %250 : vector<2x128xf32>
    %cst_46 = arith.constant 1.000000e+00 : f32
    %252 = vector.broadcast %cst_46 : f32 to vector<2x128xf32>
    %253 = arith.addf %252, %251 : vector<2x128xf32>
    %254 = arith.divf %252, %253 : vector<2x128xf32>
    %255 = arith.select %17, %249, %254 : vector<2x128xi1>, vector<2x128xf32>
    %256 = vector.extract_strided_slice %255 {offsets = [0, 0], sizes = [2, 32], strides = [1, 1]} : vector<2x128xf32> to vector<2x32xf32>
    %257 = vector.extract_strided_slice %255 {offsets = [0, 32], sizes = [2, 32], strides = [1, 1]} : vector<2x128xf32> to vector<2x32xf32>
    %258 = vector.extract_strided_slice %255 {offsets = [0, 64], sizes = [2, 32], strides = [1, 1]} : vector<2x128xf32> to vector<2x32xf32>
    %259 = vector.extract_strided_slice %255 {offsets = [0, 96], sizes = [2, 32], strides = [1, 1]} : vector<2x128xf32> to vector<2x32xf32>
    %260 = arith.mulf %257, %222 : vector<2x32xf32>
    %261 = arith.mulf %256, %258 : vector<2x32xf32>
    %262 = arith.addf %260, %261 : vector<2x32xf32>
    %263 = math.tanh %262 : vector<2x32xf32>
    %264 = arith.mulf %259, %263 : vector<2x32xf32>
    %cst_47 = arith.constant dense<0.000000e+00> : vector<2x128xf32>
    %265 = tpu.matmul %224, %23, %cst_47 {dimension_numbers = #tpu.dot_dimension_numbers<[1], [0], [0], [1], [0, 0, 1, 1], [], []>} : vector<2x32xf32>, vector<32x128xf32>, vector<2x128xf32> -> vector<2x128xf32>
    %cst_48 = arith.constant dense<0.000000e+00> : vector<2x128xf32>
    %266 = tpu.matmul %245, %21, %cst_48 {dimension_numbers = #tpu.dot_dimension_numbers<[1], [0], [0], [1], [0, 0, 1, 1], [], []>} : vector<2x32xf32>, vector<32x128xf32>, vector<2x128xf32> -> vector<2x128xf32>
    %267 = arith.addf %265, %266 : vector<2x128xf32>
    %268 = vector.broadcast %25 : vector<1x128xf32> to vector<2x128xf32>
    %269 = arith.addf %267, %268 : vector<2x128xf32>
    %270 = math.tanh %269 : vector<2x128xf32>
    %271 = arith.negf %269 : vector<2x128xf32>
    %272 = math.exp %271 : vector<2x128xf32>
    %cst_49 = arith.constant 1.000000e+00 : f32
    %273 = vector.broadcast %cst_49 : f32 to vector<2x128xf32>
    %274 = arith.addf %273, %272 : vector<2x128xf32>
    %275 = arith.divf %273, %274 : vector<2x128xf32>
    %276 = arith.select %17, %270, %275 : vector<2x128xi1>, vector<2x128xf32>
    %277 = vector.extract_strided_slice %276 {offsets = [0, 0], sizes = [2, 32], strides = [1, 1]} : vector<2x128xf32> to vector<2x32xf32>
    %278 = vector.extract_strided_slice %276 {offsets = [0, 32], sizes = [2, 32], strides = [1, 1]} : vector<2x128xf32> to vector<2x32xf32>
    %279 = vector.extract_strided_slice %276 {offsets = [0, 64], sizes = [2, 32], strides = [1, 1]} : vector<2x128xf32> to vector<2x32xf32>
    %280 = vector.extract_strided_slice %276 {offsets = [0, 96], sizes = [2, 32], strides = [1, 1]} : vector<2x128xf32> to vector<2x32xf32>
    %281 = arith.mulf %278, %243 : vector<2x32xf32>
    %282 = arith.mulf %277, %279 : vector<2x32xf32>
    %283 = arith.addf %281, %282 : vector<2x32xf32>
    %284 = math.tanh %283 : vector<2x32xf32>
    %285 = arith.mulf %280, %284 : vector<2x32xf32>
    %286 = vector.extract_strided_slice %11 {offsets = [14, 0], sizes = [2, 128], strides = [1, 1]} : vector<16x128xf32> to vector<2x128xf32>
    %cst_50 = arith.constant dense<0.000000e+00> : vector<2x128xf32>
    %287 = tpu.matmul %264, %19, %cst_50 {dimension_numbers = #tpu.dot_dimension_numbers<[1], [0], [0], [1], [0, 0, 1, 1], [], []>} : vector<2x32xf32>, vector<32x128xf32>, vector<2x128xf32> -> vector<2x128xf32>
    %288 = arith.addf %286, %287 : vector<2x128xf32>
    %289 = math.tanh %288 : vector<2x128xf32>
    %290 = arith.negf %288 : vector<2x128xf32>
    %291 = math.exp %290 : vector<2x128xf32>
    %cst_51 = arith.constant 1.000000e+00 : f32
    %292 = vector.broadcast %cst_51 : f32 to vector<2x128xf32>
    %293 = arith.addf %292, %291 : vector<2x128xf32>
    %294 = arith.divf %292, %293 : vector<2x128xf32>
    %295 = arith.select %17, %289, %294 : vector<2x128xi1>, vector<2x128xf32>
    %296 = vector.extract_strided_slice %295 {offsets = [0, 0], sizes = [2, 32], strides = [1, 1]} : vector<2x128xf32> to vector<2x32xf32>
    %297 = vector.extract_strided_slice %295 {offsets = [0, 32], sizes = [2, 32], strides = [1, 1]} : vector<2x128xf32> to vector<2x32xf32>
    %298 = vector.extract_strided_slice %295 {offsets = [0, 64], sizes = [2, 32], strides = [1, 1]} : vector<2x128xf32> to vector<2x32xf32>
    %299 = vector.extract_strided_slice %295 {offsets = [0, 96], sizes = [2, 32], strides = [1, 1]} : vector<2x128xf32> to vector<2x32xf32>
    %300 = arith.mulf %297, %262 : vector<2x32xf32>
    %301 = arith.mulf %296, %298 : vector<2x32xf32>
    %302 = arith.addf %300, %301 : vector<2x32xf32>
    %303 = math.tanh %302 : vector<2x32xf32>
    %304 = arith.mulf %299, %303 : vector<2x32xf32>
    %cst_52 = arith.constant dense<0.000000e+00> : vector<2x128xf32>
    %305 = tpu.matmul %264, %23, %cst_52 {dimension_numbers = #tpu.dot_dimension_numbers<[1], [0], [0], [1], [0, 0, 1, 1], [], []>} : vector<2x32xf32>, vector<32x128xf32>, vector<2x128xf32> -> vector<2x128xf32>
    %cst_53 = arith.constant dense<0.000000e+00> : vector<2x128xf32>
    %306 = tpu.matmul %285, %21, %cst_53 {dimension_numbers = #tpu.dot_dimension_numbers<[1], [0], [0], [1], [0, 0, 1, 1], [], []>} : vector<2x32xf32>, vector<32x128xf32>, vector<2x128xf32> -> vector<2x128xf32>
    %307 = arith.addf %305, %306 : vector<2x128xf32>
    %308 = vector.broadcast %25 : vector<1x128xf32> to vector<2x128xf32>
    %309 = arith.addf %307, %308 : vector<2x128xf32>
    %310 = math.tanh %309 : vector<2x128xf32>
    %311 = arith.negf %309 : vector<2x128xf32>
    %312 = math.exp %311 : vector<2x128xf32>
    %cst_54 = arith.constant 1.000000e+00 : f32
    %313 = vector.broadcast %cst_54 : f32 to vector<2x128xf32>
    %314 = arith.addf %313, %312 : vector<2x128xf32>
    %315 = arith.divf %313, %314 : vector<2x128xf32>
    %316 = arith.select %17, %310, %315 : vector<2x128xi1>, vector<2x128xf32>
    %317 = vector.extract_strided_slice %316 {offsets = [0, 0], sizes = [2, 32], strides = [1, 1]} : vector<2x128xf32> to vector<2x32xf32>
    %318 = vector.extract_strided_slice %316 {offsets = [0, 32], sizes = [2, 32], strides = [1, 1]} : vector<2x128xf32> to vector<2x32xf32>
    %319 = vector.extract_strided_slice %316 {offsets = [0, 64], sizes = [2, 32], strides = [1, 1]} : vector<2x128xf32> to vector<2x32xf32>
    %320 = vector.extract_strided_slice %316 {offsets = [0, 96], sizes = [2, 32], strides = [1, 1]} : vector<2x128xf32> to vector<2x32xf32>
    %321 = arith.mulf %318, %283 : vector<2x32xf32>
    %322 = arith.mulf %317, %319 : vector<2x32xf32>
    %323 = arith.addf %321, %322 : vector<2x32xf32>
    %324 = math.tanh %323 : vector<2x32xf32>
    %325 = arith.mulf %320, %324 : vector<2x32xf32>
    %cst_55 = arith.constant dense<0.000000e+00> : vector<2x128xf32>
    %326 = tpu.matmul %304, %23, %cst_55 {dimension_numbers = #tpu.dot_dimension_numbers<[1], [0], [0], [1], [0, 0, 1, 1], [], []>} : vector<2x32xf32>, vector<32x128xf32>, vector<2x128xf32> -> vector<2x128xf32>
    %cst_56 = arith.constant dense<0.000000e+00> : vector<2x128xf32>
    %327 = tpu.matmul %325, %21, %cst_56 {dimension_numbers = #tpu.dot_dimension_numbers<[1], [0], [0], [1], [0, 0, 1, 1], [], []>} : vector<2x32xf32>, vector<32x128xf32>, vector<2x128xf32> -> vector<2x128xf32>
    %328 = arith.addf %326, %327 : vector<2x128xf32>
    %329 = vector.broadcast %25 : vector<1x128xf32> to vector<2x128xf32>
    %330 = arith.addf %328, %329 : vector<2x128xf32>
    %331 = math.tanh %330 : vector<2x128xf32>
    %332 = arith.negf %330 : vector<2x128xf32>
    %333 = math.exp %332 : vector<2x128xf32>
    %cst_57 = arith.constant 1.000000e+00 : f32
    %334 = vector.broadcast %cst_57 : f32 to vector<2x128xf32>
    %335 = arith.addf %334, %333 : vector<2x128xf32>
    %336 = arith.divf %334, %335 : vector<2x128xf32>
    %337 = arith.select %17, %331, %336 : vector<2x128xi1>, vector<2x128xf32>
    %338 = vector.extract_strided_slice %337 {offsets = [0, 0], sizes = [2, 32], strides = [1, 1]} : vector<2x128xf32> to vector<2x32xf32>
    %339 = vector.extract_strided_slice %337 {offsets = [0, 32], sizes = [2, 32], strides = [1, 1]} : vector<2x128xf32> to vector<2x32xf32>
    %340 = vector.extract_strided_slice %337 {offsets = [0, 64], sizes = [2, 32], strides = [1, 1]} : vector<2x128xf32> to vector<2x32xf32>
    %341 = vector.extract_strided_slice %337 {offsets = [0, 96], sizes = [2, 32], strides = [1, 1]} : vector<2x128xf32> to vector<2x32xf32>
    %342 = arith.mulf %339, %323 : vector<2x32xf32>
    %343 = arith.mulf %338, %340 : vector<2x32xf32>
    %344 = arith.addf %342, %343 : vector<2x32xf32>
    %345 = math.tanh %344 : vector<2x32xf32>
    %346 = arith.mulf %341, %345 : vector<2x32xf32>
    %347 = tpu.concatenate %85, %125, %165, %205, %245, %285, %325, %346 in 0 : vector<2x32xf32>, vector<2x32xf32>, vector<2x32xf32>, vector<2x32xf32>, vector<2x32xf32>, vector<2x32xf32>, vector<2x32xf32>, vector<2x32xf32> -> vector<16x32xf32>
    %c0_58 = arith.constant 0 : index
    %c0_59 = arith.constant 0 : index
    %348 = vector.load %arg5[%c0_58, %c0_59] : memref<32x128xf32, #tpu.memory_space<vmem>>, vector<32x128xf32>
    %cst_60 = arith.constant dense<0.000000e+00> : vector<16x128xf32>
    %349 = tpu.matmul %347, %348, %cst_60 {dimension_numbers = #tpu.dot_dimension_numbers<[1], [0], [0], [1], [0, 0, 1, 1], [], []>} : vector<16x32xf32>, vector<32x128xf32>, vector<16x128xf32> -> vector<16x128xf32>
    %c0_61 = arith.constant 0 : index
    %c0_62 = arith.constant 0 : index
    %350 = vector.load %arg6[%c0_61, %c0_62] : memref<1x128xf32, #tpu.memory_space<vmem>>, vector<1x128xf32>
    %351 = vector.broadcast %350 : vector<1x128xf32> to vector<16x128xf32>
    %352 = arith.addf %349, %351 : vector<16x128xf32>
    %c0_63 = arith.constant 0 : index
    %c0_64 = arith.constant 0 : index
    %353 = vector.load %arg7[%c0_63, %c0_64] : memref<16x128xf32, #tpu.memory_space<vmem>>, vector<16x128xf32>
    tpu.vector_store %arg7[%c0_63, %c0_64], %352 {strides = array<i32>} : memref<16x128xf32, #tpu.memory_space<vmem>>, vector<16x128xf32>,
    %c0_65 = arith.constant 0 : index
    %c0_66 = arith.constant 0 : index
    %c0_67 = arith.constant 0 : index
    %354 = vector.load %arg8[%c0_65, %c0_66, %c0_67] : memref<2x2x32xf32, #tpu.memory_space<vmem>>, vector<1x2x32xf32>
    %355 = vector.shape_cast %354 : vector<1x2x32xf32> to vector<2x32xf32>
    %356 = vector.shape_cast %304 : vector<2x32xf32> to vector<1x2x32xf32>
    tpu.vector_store %arg8[%c0_65, %c0_66, %c0_67], %356 {strides = array<i32>} : memref<2x2x32xf32, #tpu.memory_space<vmem>>, vector<1x2x32xf32>,
    %c0_68 = arith.constant 0 : index
    %c0_69 = arith.constant 0 : index
    %c0_70 = arith.constant 0 : index
    %357 = vector.load %arg9[%c0_68, %c0_69, %c0_70] : memref<2x2x32xf32, #tpu.memory_space<vmem>>, vector<1x2x32xf32>
    %358 = vector.shape_cast %357 : vector<1x2x32xf32> to vector<2x32xf32>
    %359 = vector.shape_cast %302 : vector<2x32xf32> to vector<1x2x32xf32>
    tpu.vector_store %arg9[%c0_68, %c0_69, %c0_70], %359 {strides = array<i32>} : memref<2x2x32xf32, #tpu.memory_space<vmem>>, vector<1x2x32xf32>,
    %c1_71 = arith.constant 1 : index
    %c0_72 = arith.constant 0 : index
    %c0_73 = arith.constant 0 : index
    %360 = vector.load %arg8[%c1_71, %c0_72, %c0_73] : memref<2x2x32xf32, #tpu.memory_space<vmem>>, vector<1x2x32xf32>
    %361 = vector.shape_cast %360 : vector<1x2x32xf32> to vector<2x32xf32>
    %362 = vector.shape_cast %346 : vector<2x32xf32> to vector<1x2x32xf32>
    tpu.vector_store %arg8[%c1_71, %c0_72, %c0_73], %362 {strides = array<i32>} : memref<2x2x32xf32, #tpu.memory_space<vmem>>, vector<1x2x32xf32>,
    %c1_74 = arith.constant 1 : index
    %c0_75 = arith.constant 0 : index
    %c0_76 = arith.constant 0 : index
    %363 = vector.load %arg9[%c1_74, %c0_75, %c0_76] : memref<2x2x32xf32, #tpu.memory_space<vmem>>, vector<1x2x32xf32>
    %364 = vector.shape_cast %363 : vector<1x2x32xf32> to vector<2x32xf32>
    %365 = vector.shape_cast %344 : vector<2x32xf32> to vector<1x2x32xf32>
    tpu.vector_store %arg9[%c1_74, %c0_75, %c0_76], %365 {strides = array<i32>} : memref<2x2x32xf32, #tpu.memory_space<vmem>>, vector<1x2x32xf32>,
    return
  }
}

</mosaic_0001>

<bundles_post_ra>
// kernel: _base_decoder_forward.1
= control target key start
LH: loop header
LB: loop body
LE: loop exit
PB: predicated region body
PF: predicated region fallthrough
CT: control target
= control target key end

     0   :  { %15 = vsyncpa [#allocation3], 0  ;;  %s3991_s0 = inlined_call_operand.vmem [shape: s32[16,1], index: 0, kind: input, shape index: {}]   ;;  %s3992_s1 = inlined_call_operand.vmem [shape: f32[40,128], index: 1, kind: input, shape index: {}]   ;;  %s3993_s2 = inlined_call_operand.hbm [shape: f32[1,32,128], index: 2, kind: input, shape index: {}]   ;;  %s3994_s3 = inlined_call_operand.hbm [shape: f32[2,32,128], index: 3, kind: input, shape index: {}]   ;;  %s3995_s4 = inlined_call_operand.hbm [shape: f32[2,1,128], index: 4, kind: input, shape index: {}]   ;;  %s3996_s5 = inlined_call_operand.hbm [shape: f32[32,128], index: 5, kind: input, shape index: {}]   ;;  %s3997_s6 = inlined_call_operand.vmem [shape: f32[1,128], index: 6, kind: input, shape index: {}]   ;;  %s3998_s7 = inlined_call_operand.vmem [shape: f32[16,128], index: 7, kind: output, shape index: {0}]   ;;  %s3999_s8 = inlined_call_operand.hbm [shape: f32[2,2,32], index: 8, kind: output, shape index: {1}]   ;;  %s4000_s9 = inlined_call_operand.hbm [shape: f32[2,2,32], index: 9, kind: output, shape index: {2}]  }
   0x1   :  { %16 = vsyncpa [#allocation6], 0 }
   0x2   :  { %17 = vsyncpa [#allocation9], 0 }
   0x3   :  { %18 = vsyncpa [#allocation4], 0 }
   0x4   :  { %19 = vsyncpa [#allocation12], 0  ;;  %s3378_s30 = smov [#allocation5]   ;;  %s3379_s11 = smov [#allocation2]  }
   0x5   :  { %s41_s10 = sshll.u32 %s3378_s30, 4  ;;  %s29_s12 = sshll.u32 %s3379_s11, 4  ;;  %s42_s10 = int_to_ptr.vmem [resolvable:$true] %s41_s10  ;;  %s30_s12 = int_to_ptr.vmem [resolvable:$true] %s29_s12 }
   0x6   :  { %s3256_s13 = scalar_lea.vmem %s42_s10, 1024  ;;  %p3261_p1 = scmp.lt.s32.totalorder %s42_s10, %s42_s10 }
   0x7   :  { %p3257_p0 = scmp.ne.s32.totalorder %s42_s10, %s3256_s13  ;;  %p3262_p2 = scmp.lt.s32.totalorder %s3256_s13, %s3256_s13 }
   0x9   :  { %p3263_p3 = por %p3262_p2, %p3261_p1 }
   0xb   :  { %p3264_p4 = pnand %p3263_p3, %p3257_p0 }
   0xd   :  { %3267 = shalt.err (!%p3264_p4)
}
   0xe   :  { %s3380_s14 = smov 128   ;;  %s3381_s15 = smov 8  }
   0xf   :  { %47 = dma.hbm_to_vmem [thread:$0]  %s3994_s3, 1024, %s42_s10, [#allocation6], %s3380_s14, %s3380_s14, %s3381_s15  }
  0x10   :  { %s3276_s18 = scalar_lea.vmem %s30_s12, 512  ;;  %p3281_p6 = scmp.lt.s32.totalorder %s30_s12, %s30_s12 }
  0x11   :  { %p3277_p5 = scmp.ne.s32.totalorder %s30_s12, %s3276_s18  ;;  %p3282_p7 = scmp.lt.s32.totalorder %s3276_s18, %s3276_s18 }
  0x13   :  { %p3283_p8 = por %p3282_p7, %p3281_p6 }
  0x15   :  { %p3284_p9 = pnand %p3283_p8, %p3277_p5 }
  0x17   :  { %3287 = shalt.err (!%p3284_p9)
}
  0x18   :  { %35 = dma.hbm_to_vmem [thread:$0]  %s3993_s2, 512, %s30_s12, [#allocation3], %s3380_s14, %s3380_s14, %s3381_s15  }
  0x19   :  { %s3382_s21 = smov [#allocation7]  }
  0x1a   :  { %s53_s22 = sshll.u32 %s3382_s21, 4  ;;  %s54_s22 = int_to_ptr.vmem [resolvable:$true] %s53_s22 }
  0x1b   :  { %s3296_s23 = scalar_lea.vmem %s54_s22, 32  ;;  %p3301_p11 = scmp.lt.s32.totalorder %s54_s22, %s54_s22 }
  0x1c   :  { %p3297_p10 = scmp.ne.s32.totalorder %s54_s22, %s3296_s23  ;;  %p3302_p12 = scmp.lt.s32.totalorder %s3296_s23, %s3296_s23 }
  0x1e   :  { %p3303_p13 = por %p3302_p12, %p3301_p11 }
  0x20   :  { %p3304_p0 = pnand %p3303_p13, %p3297_p10 }
  0x22   :  { %3307 = shalt.err (!%p3304_p0)
}
  0x23   :  { %s3383_s3 = smov 16   ;;  %s3384_s24 = smov 1  }
  0x24   :  { %59 = dma.hbm_to_vmem [thread:$0]  %s3995_s4, 32, %s54_s22, [#allocation6], %s3383_s3, %s3383_s3, %s3384_s24  }
  0x25   :  { %s3385_s27 = smov [#allocation8]  }
  0x26   :  { %s65_s28 = sshll.u32 %s3385_s27, 4  ;;  %s66_s28 = int_to_ptr.vmem [resolvable:$true] %s65_s28 }
  0x27   :  { %s3316_s2 = scalar_lea.vmem %s66_s28, 512  ;;  %p3321_p2 = scmp.lt.s32.totalorder %s66_s28, %s66_s28 }
  0x28   :  { %p3317_p1 = scmp.ne.s32.totalorder %s66_s28, %s3316_s2  ;;  %p3322_p3 = scmp.lt.s32.totalorder %s3316_s2, %s3316_s2 }
  0x2a   :  { %p3323_p4 = por %p3322_p3, %p3321_p2 }
  0x2c   :  { %p3324_p5 = pnand %p3323_p4, %p3317_p1 }
  0x2e   :  { %3327 = shalt.err (!%p3324_p5)
}
  0x2f   :  { %71 = dma.hbm_to_vmem [thread:$0]  %s3996_s5, 512, %s66_s28, [#allocation9], %s3380_s14, %s3380_s14, %s3381_s15  }
  0x30   :  { %3368 = dma.done.wait [#allocation3], 512  }
  0x31   :  { %3369 = vsyncadd [#allocation3], 4294966784 }
  0x32   :  { %3370 = dma.done.wait [#allocation6], 1056  }
  0x33   :  { %3371 = vsyncadd [#allocation6], 4294966240 }
  0x34   :  { %3372 = dma.done.wait [#allocation9], 512  }
  0x35   :  { %3373 = vsyncadd [#allocation9], 4294966784  ;;  %v3386_v0 = vmov 0   ;;  %v3387_v1 = vmov 0.0   ;;  %v86_v2 = vld [vmem:[%s3991_s0] sm:$0xff]  ;;  %v105_v4 = vld [vmem:[%s3992_s1 + $0x18] sm:$0xff]  ;;  %v88_v13 = vlaneseq }
  0x36   :  { %3106 = vset.pattern.permute.xlu0 %v3386_v0  ;;  %2814 = vmatprep.subr.mxu1 %v3387_v1  ;;  %v106_v3 = vld [vmem:[%s3992_s1 + $0x20] sm:$0xff]  ;;  %v3476_v5 = vld [vmem:[#allocation5 + $0x18] sm:$0xff]  ;;  %v87_v6 = vld [vmem:[%s3991_s0 + $0x8] sm:$0xff]  ;;  %vm3388_vm0 = vmmov 0   ;;  %vm114_vm1 = vcmask 326656   ;;  %s3390_s21 = smov 32  }
  0x37   :  { %91 = vperm.xlu0 %3106, %v86_v2   ;;  %2801 = vmatprep.subr.mxu0 %v106_v3  ;;  %v104_v7 = vld [vmem:[%s3992_s1 + $0x10] sm:$0xff]  ;;  %v103_v9 = vld [vmem:[%s3992_s1 + $0x8] sm:$0xff]  ;;  %v102_v11 = vld [vmem:[%s3992_s1] sm:$0xff]  ;;  %v89_v14 = vand.u32 127, %v88_v13  ;;  %s3389_s1 = smov 64   ;;  %vm214_vm7 = vcmask 261120  }
  0x38   :  { %2802 = vmatpush3.msra.mxu0 %v106_v3  ;;  %2815 = vmatpush3.msra.mxu1 %v3476_v5  ;;  %v3485_v8 = vld [vmem:[#allocation5 + $0x10] sm:$0xff]  ;;  %v3492_v10 = vld [vmem:[#allocation5 + $0x8] sm:$0xff]  ;;  %v3498_v12 = vld [vmem:[#allocation5] sm:$0xff]  ;;  %vm2453_vm8 = vcmask 1041408   ;;  %vm2455_vm9 = vcmask 1043456   ;;  %vm2457_vm10 = vcmask 1045504  }
  0x39   :  { %2803 = vmatprep.subr.mxu0 %v105_v4  ;;  %2816 = vmatprep.subr.mxu1 %v3387_v1  ;;  %v2623_v21 = vld [vmem:[#allocation7] ss:$0 sm:$0xff]  ;;  %vm196_vm4 = vcmp.ge.s32.totalorder %v89_v14, 64  ;;  %vm197_vm5 = vcmp.lt.s32.totalorder %v89_v14, 96  ;;  %v3539_v40 = vld [vmem:[#allocation5 + $0x38] sm:$0xff]  ;;  %v3543_v41 = vld [vmem:[#allocation5 + $0x30] sm:$0xff] }
  0x3a   :  { %2804 = vmatpush3.msra.mxu0 %v105_v4  ;;  %2817 = vmatpush3.msra.mxu1 %v3485_v8  ;;  %vm3527_vm6 = vmand %vm196_vm4, %vm197_vm5  ;;  %v3547_v42 = vld [vmem:[#allocation5 + $0x28] sm:$0xff]  ;;  %v3551_v43 = vld [vmem:[#allocation5 + $0x20] sm:$0xff]  ;;  %vm2563_vm11 = vcmask 261126   ;;  %s3391_s22 = smov 96   ;;  %vm2574_vm12 = vcmask 254976   ;;  %s3392_s23 = smov [#allocation10]  }
  0x3b   :  { %94 = vperm.xlu0 %3106, %v87_v6   ;;  %2805 = vmatprep.subr.mxu0 %v104_v7  ;;  %v3567_v46 = vld [vmem:[#allocation2 + $0x18] sm:$0xff]  ;;  %v3570_v48 = vld [vmem:[#allocation2 + $0x10] sm:$0xff]  ;;  %v3576_v49 = vld [vmem:[#allocation2 + $0x8] sm:$0xff]  ;;  %s2589_s3 = sshll.u32 %s3392_s23, 4  ;;  %s3393_s24 = smov [#allocation11]   ;;  %s2590_s3 = int_to_ptr.vmem [resolvable:$true] %s2589_s3 }
  0x3c   :  { %2806 = vmatpush3.msra.mxu0 %v104_v7  ;;  %2818 = vmatprep.subr.mxu1 %v3387_v1  ;;  %v3580_v50 = vld [vmem:[#allocation2] sm:$0xff]  ;;  %s2601_s25 = sshll.u32 %s3393_s24, 4  ;;  %s3328_s26 = scalar_lea.vmem %s2590_s3, 64  ;;  %s2602_s25 = int_to_ptr.vmem [resolvable:$true] %s2601_s25 }
  0x3d   :  { %2807 = vmatprep.subr.mxu0 %v103_v9  ;;  %2819 = vmatpush3.msra.mxu1 %v3492_v10  ;;  %v3598_v58 = vld [vmem:[#allocation7 + $0x1] ss:$0 sm:$0xff]  ;;  %p3329_p6 = scmp.ne.s32.totalorder %s2590_s3, %s3328_s26  ;;  %p3333_p7 = scmp.lt.s32.totalorder %s2590_s3, %s2590_s3 }
  0x3e   :  { %2808 = vmatpush3.msra.mxu0 %v103_v9  ;;  %2820 = vmatprep.subr.mxu1 %v3387_v1  ;;  %p3334_p8 = scmp.lt.s32.totalorder %s3328_s26, %s3328_s26 }
  0x3f   :  { %2809 = vmatprep.subr.mxu0 %v102_v11  ;;  %2821 = vmatpush3.msra.mxu1 %v3498_v12 }
  0x40   :  { %2810 = vmatpush3.msra.mxu0 %v102_v11  ;;  %2822 = vmatprep.mubr.msk.f32.mxu1 %vm3388_vm0, %v3387_v1  ;;  %p3335_p9 = por %p3334_p8, %p3333_p7 }
  0x41   :  { %2823 = vmatmul.mubr.f32.vlgmr.msra.gmra.mxu1 %v3387_v1  ;;  %2825 = vmatprep.subr.mxu1 %v3387_v1 }
  0x42   :  { %2826 = vmatpush3.msra.mxu1 %v3476_v5  ;;  %2833 = vmatprep.mubr.msk.f32.mxu1 %vm3388_vm0, %v3387_v1  ;;  %p3336_p10 = pnand %p3335_p9, %p3329_p6 }
  0x43   :  { %2827 = vmatprep.subr.mxu1 %v3387_v1  ;;  %2836 = vmatprep.subr.mxu0 %v3387_v1 }
  0x44   :  { %2828 = vmatpush3.msra.mxu1 %v3485_v8 }
  0x45   :  { %2829 = vmatprep.subr.mxu1 %v3387_v1 }
  0x46   :  { %2830 = vmatpush3.msra.mxu1 %v3492_v10 }
  0x47   :  { %2831 = vmatprep.subr.mxu1 %v3387_v1 }
  0x48   :  { %2832 = vmatpush3.msra.mxu1 %v3498_v12 }
  0x49   :  { %2847 = vmatprep.subr.mxu1 %v3387_v1 }
  0xb2   :  { %v92_v15 = vpop.permute.xlu0 %91 }
  0xb3   :  { %vm96_vm2 = vcmp.eq.s32.totalorder %v92_v15, %v89_v14 }
  0xb4   :  { %v2621_v16 = vsel %vm96_vm2, 1.0, %v3387_v1 }
  0xb5   :  { %2811 = vmatprep.mubr.msk.f32.mxu0 %vm114_vm1, %v2621_v16 }
  0xb6   :  { %v95_v17 = vpop.permute.xlu0 %94 }
  0xb7   :  { %vm97_vm3 = vcmp.eq.s32.totalorder %v95_v17, %v89_v14 }
  0xb8   :  { %v2622_v18 = vsel %vm97_vm3, 1.0, %v3387_v1 }
  0xb9   :  { %2812 = vmatmul.mubr.msk.f32.vlgmr.msra.gmra.mxu0 %vm114_vm1, %v2622_v18 }
  0xba   :  { %2844 = vmatprep.mubr.msk.f32.mxu0 %vm3388_vm0, %v3387_v1  ;;  %2837 = vmatpush3.msra.mxu0 %v3539_v40 }
  0xbb   :  { %2838 = vmatprep.subr.mxu0 %v3387_v1 }
  0xbc   :  { %2839 = vmatpush3.msra.mxu0 %v3543_v41 }
  0xbd   :  { %2840 = vmatprep.subr.mxu0 %v3387_v1 }
  0xbe   :  { %2841 = vmatpush3.msra.mxu0 %v3547_v42 }
  0xbf   :  { %2842 = vmatprep.subr.mxu0 %v3387_v1 }
  0xc0   :  { %2843 = vmatpush3.msra.mxu0 %v3551_v43 }
  0xc1   :  { %2845 = vmatmul.mubr.f32.vlgmr.msra.gmra.mxu0 %v3387_v1  ;;  %2858 = vmatprep.subr.mxu0 %v3387_v1 }
  0xc2   :  { %2859 = vmatpush3.msra.mxu0 %v3476_v5  ;;  %2866 = vmatprep.mubr.msk.f32.mxu0 %vm3388_vm0, %v3387_v1 }
  0xc3   :  { %2860 = vmatprep.subr.mxu0 %v3387_v1 }
  0xc4   :  { %2861 = vmatpush3.msra.mxu0 %v3485_v8 }
  0xc5   :  { %2862 = vmatprep.subr.mxu0 %v3387_v1 }
  0xc6   :  { %2863 = vmatpush3.msra.mxu0 %v3492_v10 }
  0xc7   :  { %2864 = vmatprep.subr.mxu0 %v3387_v1 }
  0xc8   :  { %2865 = vmatpush3.msra.mxu0 %v3498_v12 }
  0xc9   :  { %2880 = vmatprep.subr.mxu0 %v3387_v1 }
 0x101   :  { %v284_v19 = vpop.f32.mrf.mxu1 }
 0x103   :  { %v2824_v20 = vpop.f32.mrf.mxu1 }
 0x179   :  { %v2813_v22 = vpop.f32.mrf.mxu0 }
 0x17a   :  { %v3522_v23 = vadd.f32 %v2813_v22, %v2623_v21 }
 0x17b   :  { %v187_v24 = vpop.f32.mrf.mxu0 }
 0x17c   :  { %v3524_v25 = vadd.f32 %v2623_v21, %v187_v24 }
 0x17e   :  { %v288_v26 = vadd.f32 %v284_v19, %v3524_v25 }
 0x180   :  { %v2626_v27 = vmul.f32 -1.442695, %v288_v26 }
 0x181   :  { %v487_v51 = vpop.f32.mrf.mxu0 }
 0x182   :  { %3107 = vpow2.f32 %v2626_v27 }
 0x183   :  { %3109 = vtanh.f32 %v288_v26  ;;  %v2846_v52 = vpop.f32.mrf.mxu0 }
 0x18f   :  { %v3108_v28 = vpop.eup %3107 }
 0x190   :  { %v293_v29 = vadd.f32 1.0, %v3108_v28  ;;  %v3110_v31 = vpop.eup %3109 }
 0x192   :  { %3111 = vrcp.f32 %v293_v29 }
 0x19f   :  { %v3112_v32 = vpop.eup %3111 }
 0x1a0   :  { %v296_v33 = vsel %vm3527_vm6, %v3110_v31, %v3112_v32 }
 0x1a1   :  { %299 = vrot.lane.b32.xlu1 %v296_v33, %s3389_s1  ;;  %v297_v36 = vmul.f32 0.0, %v296_v33 }
 0x213   :  { %v300_v34 = vpop.permute.xlu1 %299 }
 0x214   :  { %v302_v35 = vmul.f32 %v300_v34, %v296_v33 }
 0x216   :  { %304 = vrot.lane.b32.xlu1 %v302_v35, %s3390_s21 }
 0x288   :  { %v305_v37 = vpop.permute.xlu1 %304 }
 0x289   :  { %v3535_v38 = vadd.f32 %v305_v37, %v297_v36 }
 0x28b   :  { %3113 = vtanh.f32 %v3535_v38  ;;  %v402_v19 = vrot.slane %v3535_v38, 6 }
 0x298   :  { %v3114_v39 = vpop.eup %3113 }
 0x299   :  { %310 = vrot.lane.b32.xlu0 %v3114_v39, %s3389_s1 }
 0x30b   :  { %v311_v44 = vpop.permute.xlu0 %310 }
 0x30c   :  { %v313_v45 = vmul.f32 %v311_v44, %v296_v33 }
 0x30e   :  { %315 = vrot.lane.b32.xlu1 %v313_v45, %s3390_s21 }
 0x380   :  { %v316_v47 = vpop.permute.xlu1 %315 }
 0x381   :  { %2834 = vmatmul.mubr.msk.f32.vlgmr.msra.gmra.mxu1 %vm214_vm7, %v316_v47 }
 0x382   :  { %2848 = vmatpush3.msra.mxu1 %v3567_v46  ;;  %2855 = vmatprep.mubr.msk.f32.mxu1 %vm3388_vm0, %v3387_v1 }
 0x383   :  { %2849 = vmatprep.subr.mxu1 %v3387_v1 }
 0x384   :  { %2850 = vmatpush3.msra.mxu1 %v3570_v48 }
 0x385   :  { %2851 = vmatprep.subr.mxu1 %v3387_v1 }
 0x386   :  { %2852 = vmatpush3.msra.mxu1 %v3576_v49 }
 0x387   :  { %2853 = vmatprep.subr.mxu1 %v3387_v1 }
 0x388   :  { %2854 = vmatpush3.msra.mxu1 %v3580_v50 }
 0x389   :  { %2856 = vmatmul.mubr.msk.f32.vlgmr.msra.gmra.mxu1 %vm214_vm7, %v316_v47  ;;  %2869 = vmatprep.subr.mxu1 %v3387_v1 }
 0x38a   :  { %2870 = vmatpush3.msra.mxu1 %v3539_v40  ;;  %2877 = vmatprep.mubr.msk.f32.mxu1 %vm3388_vm0, %v3387_v1 }
 0x38b   :  { %2871 = vmatprep.subr.mxu1 %v3387_v1 }
 0x38c   :  { %2872 = vmatpush3.msra.mxu1 %v3543_v41 }
 0x38d   :  { %2873 = vmatprep.subr.mxu1 %v3387_v1 }
 0x38e   :  { %2874 = vmatpush3.msra.mxu1 %v3547_v42 }
 0x38f   :  { %2875 = vmatprep.subr.mxu1 %v3387_v1 }
 0x390   :  { %2876 = vmatpush3.msra.mxu1 %v3551_v43 }
 0x391   :  { %2891 = vmatprep.subr.mxu1 %v3387_v1 }
 0x441   :  { %v385_v53 = vpop.f32.mrf.mxu1 }
 0x442   :  { %v390_v54 = vrot.slane %v385_v53, 6 }
 0x443   :  { %v2835_v55 = vpop.f32.mrf.mxu1 }
 0x444   :  { %v392_v56 = vadd.f32 %v390_v54, %v3524_v25 }
 0x446   :  { %v2628_v57 = vmul.f32 -1.442695, %v392_v56 }
 0x448   :  { %3115 = vpow2.f32 %v2628_v57 }
 0x449   :  { %v557_v59 = vpop.f32.mrf.mxu1 }
 0x44a   :  { %v558_v60 = vadd.f32 %v557_v59, %v487_v51 }
 0x44b   :  { %v2857_v61 = vpop.f32.mrf.mxu1 }
 0x44c   :  { %v567_v62 = vadd.f32 %v3598_v58, %v558_v60 }
 0x44e   :  { %v2631_v63 = vmul.f32 -1.442695, %v567_v62 }
 0x450   :  { %3117 = vpow2.f32 %v2631_v63 }
 0x451   :  { %3119 = vtanh.f32 %v392_v56 }
 0x455   :  { %v3116_v0 = vpop.eup %3115 }
 0x456   :  { %v397_v2 = vadd.f32 1.0, %v3116_v0 }
 0x458   :  { %3121 = vrcp.f32 %v397_v2 }
 0x459   :  { %3123 = vtanh.f32 %v567_v62 }
 0x45d   :  { %v3118_v3 = vpop.eup %3117 }
 0x45e   :  { %v572_v4 = vadd.f32 1.0, %v3118_v3  ;;  %v3120_v6 = vpop.eup %3119 }
 0x460   :  { %3125 = vrcp.f32 %v572_v4 }
 0x465   :  { %v3122_v7 = vpop.eup %3121 }
 0x466   :  { %v400_v9 = vsel %vm3527_vm6, %v3120_v6, %v3122_v7  ;;  %v3124_v11 = vpop.eup %3123 }
 0x467   :  { %406 = vrot.lane.b32.xlu0 %v400_v9, %s3389_s1  ;;  %v404_v20 = vmul.f32 %v402_v19, %v400_v9 }
 0x46d   :  { %v3126_v13 = vpop.eup %3125 }
 0x46e   :  { %v575_v14 = vsel %vm3527_vm6, %v3124_v11, %v3126_v13 }
 0x46f   :  { %578 = vrot.lane.b32.xlu1 %v575_v14, %s3389_s1  ;;  %v576_v24 = vmul.f32 0.0, %v575_v14 }
 0x4d9   :  { %v407_v15 = vpop.permute.xlu0 %406 }
 0x4da   :  { %v409_v16 = vmul.f32 %v407_v15, %v400_v9 }
 0x4dc   :  { %411 = vrot.lane.b32.xlu0 %v409_v16, %s3390_s21 }
 0x4e1   :  { %v579_v17 = vpop.permute.xlu1 %578 }
 0x4e2   :  { %v581_v18 = vmul.f32 %v579_v17, %v575_v14 }
 0x4e4   :  { %583 = vrot.lane.b32.xlu1 %v581_v18, %s3390_s21 }
 0x54e   :  { %v412_v21 = vpop.permute.xlu0 %411 }
 0x54f   :  { %v3610_v22 = vadd.f32 %v412_v21, %v404_v20 }
 0x551   :  { %3127 = vtanh.f32 %v3610_v22 }
 0x556   :  { %v584_v26 = vpop.permute.xlu1 %583 }
 0x557   :  { %v3613_v27 = vadd.f32 %v584_v26, %v576_v24 }
 0x559   :  { %3129 = vtanh.f32 %v3613_v27 }
 0x55e   :  { %v3128_v28 = vpop.eup %3127 }
 0x55f   :  { %417 = vrot.lane.b32.xlu0 %v3128_v28, %s3389_s1 }
 0x566   :  { %v3130_v29 = vpop.eup %3129 }
 0x567   :  { %589 = vrot.lane.b32.xlu1 %v3130_v29, %s3389_s1 }
 0x5d1   :  { %v418_v31 = vpop.permute.xlu0 %417 }
 0x5d2   :  { %v420_v32 = vmul.f32 %v418_v31, %v400_v9 }
 0x5d4   :  { %v594_v33 = vrot.slane %v420_v32, 2 }
 0x5d6   :  { %595 = vrot.lane.b32.xlu0 %v594_v33, %s3390_s21 }
 0x5d9   :  { %v590_v34 = vpop.permute.xlu1 %589 }
 0x5da   :  { %v3619_v35 = vmul.f32 %v590_v34, %v575_v14  ;;  %v682_v14 = vrot.slane %v3610_v22, 6 }
 0x5dc   :  { %702 = vrot.lane.b32.xlu1 %v3619_v35, %s3390_s21 }
 0x648   :  { %v596_v36 = vpop.permute.xlu0 %595 }
 0x649   :  { %2867 = vmatmul.mubr.msk.f32.vlgmr.msra.gmra.mxu0 %vm214_vm7, %v596_v36 }
 0x64a   :  { %2881 = vmatpush3.msra.mxu0 %v3567_v46  ;;  %2888 = vmatprep.mubr.msk.f32.mxu0 %vm3388_vm0, %v3387_v1 }
 0x64b   :  { %2882 = vmatprep.subr.mxu0 %v3387_v1 }
 0x64c   :  { %2883 = vmatpush3.msra.mxu0 %v3570_v48 }
 0x64d   :  { %2884 = vmatprep.subr.mxu0 %v3387_v1 }
 0x64e   :  { %2885 = vmatpush3.msra.mxu0 %v3576_v49  ;;  %v703_v37 = vpop.permute.xlu1 %702 }
 0x64f   :  { %2878 = vmatmul.mubr.msk.f32.vlgmr.msra.gmra.mxu1 %vm214_vm7, %v703_v37  ;;  %2886 = vmatprep.subr.mxu0 %v3387_v1 }
 0x650   :  { %2887 = vmatpush3.msra.mxu0 %v3580_v50  ;;  %2892 = vmatpush3.msra.mxu1 %v3476_v5 }
 0x651   :  { %2889 = vmatmul.mubr.msk.f32.vlgmr.msra.gmra.mxu0 %vm214_vm7, %v596_v36  ;;  %2893 = vmatprep.subr.mxu1 %v3387_v1 }
 0x652   :  { %2894 = vmatpush3.msra.mxu1 %v3485_v8  ;;  %2902 = vmatprep.subr.mxu0 %v3387_v1 }
 0x653   :  { %2895 = vmatprep.subr.mxu1 %v3387_v1  ;;  %2903 = vmatpush3.msra.mxu0 %v3539_v40 }
 0x654   :  { %2896 = vmatpush3.msra.mxu1 %v3492_v10  ;;  %2904 = vmatprep.subr.mxu0 %v3387_v1 }
 0x655   :  { %2897 = vmatprep.subr.mxu1 %v3387_v1  ;;  %2899 = vmatprep.mubr.msk.f32.mxu1 %vm3388_vm0, %v3387_v1 }
 0x656   :  { %2898 = vmatpush3.msra.mxu1 %v3498_v12  ;;  %2905 = vmatpush3.msra.mxu0 %v3543_v41 }
 0x657   :  { %2913 = vmatprep.subr.mxu1 %v3387_v1  ;;  %2906 = vmatprep.subr.mxu0 %v3387_v1 }
 0x658   :  { %2907 = vmatpush3.msra.mxu0 %v3547_v42  ;;  %2910 = vmatprep.mubr.msk.f32.mxu0 %vm3388_vm0, %v3387_v1 }
 0x659   :  { %2908 = vmatprep.subr.mxu0 %v3387_v1 }
 0x65a   :  { %2909 = vmatpush3.msra.mxu0 %v3551_v43 }
 0x65b   :  { %2924 = vmatprep.subr.mxu0 %v3387_v1 }
 0x709   :  { %v665_v38 = vpop.f32.mrf.mxu0 }
 0x70a   :  { %v670_v39 = vrot.slane %v665_v38, 4 }
 0x70b   :  { %v2868_v44 = vpop.f32.mrf.mxu0 }
 0x70c   :  { %v672_v45 = vadd.f32 %v670_v39, %v3524_v25 }
 0x70e   :  { %v2633_v47 = vmul.f32 -1.442695, %v672_v45 }
 0x70f   :  { %v772_v51 = vpop.f32.mrf.mxu1 }
 0x710   :  { %3131 = vpow2.f32 %v2633_v47 }
 0x711   :  { %v2879_v52 = vpop.f32.mrf.mxu1  ;;  %v842_v53 = vpop.f32.mrf.mxu0 }
 0x712   :  { %v843_v54 = vadd.f32 %v842_v53, %v772_v51 }
 0x713   :  { %v2890_v55 = vpop.f32.mrf.mxu0 }
 0x714   :  { %v846_v56 = vadd.f32 %v3598_v58, %v843_v54 }
 0x716   :  { %v2636_v57 = vmul.f32 -1.442695, %v846_v56 }
 0x718   :  { %3133 = vpow2.f32 %v2636_v57 }
 0x719   :  { %3135 = vtanh.f32 %v672_v45 }
 0x71d   :  { %v3132_v59 = vpop.eup %3131 }
 0x71e   :  { %v677_v60 = vadd.f32 1.0, %v3132_v59 }
 0x720   :  { %3137 = vrcp.f32 %v677_v60 }
 0x721   :  { %3139 = vtanh.f32 %v846_v56 }
 0x725   :  { %v3134_v61 = vpop.eup %3133 }
 0x726   :  { %v851_v62 = vadd.f32 1.0, %v3134_v61  ;;  %v3136_v63 = vpop.eup %3135 }
 0x728   :  { %3141 = vrcp.f32 %v851_v62 }
 0x72d   :  { %v3138_v0 = vpop.eup %3137 }
 0x72e   :  { %v680_v2 = vsel %vm3527_vm6, %v3136_v63, %v3138_v0  ;;  %v3140_v3 = vpop.eup %3139 }
 0x72f   :  { %686 = vrot.lane.b32.xlu0 %v680_v2, %s3389_s1  ;;  %v684_v15 = vmul.f32 %v682_v14, %v680_v2 }
 0x735   :  { %v3142_v4 = vpop.eup %3141 }
 0x736   :  { %v854_v6 = vsel %vm3527_vm6, %v3140_v3, %v3142_v4 }
 0x737   :  { %857 = vrot.lane.b32.xlu1 %v854_v6, %s3389_s1  ;;  %v855_v18 = vmul.f32 %v854_v6, %v3613_v27 }
 0x7a1   :  { %v687_v7 = vpop.permute.xlu0 %686 }
 0x7a2   :  { %v689_v9 = vmul.f32 %v687_v7, %v680_v2 }
 0x7a4   :  { %691 = vrot.lane.b32.xlu0 %v689_v9, %s3390_s21 }
 0x7a9   :  { %v858_v11 = vpop.permute.xlu1 %857 }
 0x7aa   :  { %v860_v13 = vmul.f32 %v858_v11, %v854_v6 }
 0x7ac   :  { %862 = vrot.lane.b32.xlu1 %v860_v13, %s3390_s21 }
 0x816   :  { %v692_v16 = vpop.permute.xlu0 %691 }
 0x817   :  { %v3667_v17 = vadd.f32 %v692_v16, %v684_v15 }
 0x819   :  { %3143 = vtanh.f32 %v3667_v17 }
 0x81e   :  { %v863_v19 = vpop.permute.xlu1 %862 }
 0x81f   :  { %v3671_v20 = vadd.f32 %v863_v19, %v855_v18 }
 0x821   :  { %3145 = vtanh.f32 %v3671_v20 }
 0x826   :  { %v3144_v21 = vpop.eup %3143 }
 0x827   :  { %697 = vrot.lane.b32.xlu0 %v3144_v21, %s3389_s1 }
 0x82e   :  { %v3146_v24 = vpop.eup %3145 }
 0x82f   :  { %868 = vrot.lane.b32.xlu1 %v3146_v24, %s3389_s1 }
 0x899   :  { %v698_v22 = vpop.permute.xlu0 %697 }
 0x89a   :  { %v700_v26 = vmul.f32 %v698_v22, %v680_v2 }
 0x89c   :  { %v873_v28 = vrot.slane %v700_v26, 4 }
 0x89e   :  { %874 = vrot.lane.b32.xlu0 %v873_v28, %s3390_s21 }
 0x8a1   :  { %v869_v29 = vpop.permute.xlu1 %868 }
 0x8a2   :  { %v3677_v31 = vmul.f32 %v869_v29, %v854_v6  ;;  %v961_v6 = vrot.slane %v3667_v17, 6 }
 0x8a4   :  { %981 = vrot.lane.b32.xlu1 %v3677_v31, %s3390_s21  ;;  %v2440_v24 = vrot.slane %v3677_v31, 6 }
 0x8a6   :  { %v2454_v28 = vsel %vm2453_vm8, %v3619_v35, %v2440_v24 }
 0x910   :  { %v875_v27 = vpop.permute.xlu0 %874 }
 0x911   :  { %2900 = vmatmul.mubr.msk.f32.vlgmr.msra.gmra.mxu1 %vm214_vm7, %v875_v27 }
 0x912   :  { %2914 = vmatpush3.msra.mxu1 %v3567_v46  ;;  %2921 = vmatprep.mubr.msk.f32.mxu1 %vm3388_vm0, %v3387_v1 }
 0x913   :  { %2915 = vmatprep.subr.mxu1 %v3387_v1 }
 0x914   :  { %2916 = vmatpush3.msra.mxu1 %v3570_v48 }
 0x915   :  { %2917 = vmatprep.subr.mxu1 %v3387_v1 }
 0x916   :  { %2918 = vmatpush3.msra.mxu1 %v3576_v49  ;;  %v982_v32 = vpop.permute.xlu1 %981 }
 0x917   :  { %2911 = vmatmul.mubr.msk.f32.vlgmr.msra.gmra.mxu0 %vm214_vm7, %v982_v32  ;;  %2919 = vmatprep.subr.mxu1 %v3387_v1 }
 0x918   :  { %2920 = vmatpush3.msra.mxu1 %v3580_v50  ;;  %2925 = vmatpush3.msra.mxu0 %v3476_v5 }
 0x919   :  { %2922 = vmatmul.mubr.msk.f32.vlgmr.msra.gmra.mxu1 %vm214_vm7, %v875_v27  ;;  %2926 = vmatprep.subr.mxu0 %v3387_v1 }
 0x91a   :  { %2927 = vmatpush3.msra.mxu0 %v3485_v8  ;;  %2935 = vmatprep.subr.mxu1 %v3387_v1 }
 0x91b   :  { %2928 = vmatprep.subr.mxu0 %v3387_v1  ;;  %2936 = vmatpush3.msra.mxu1 %v3539_v40 }
 0x91c   :  { %2929 = vmatpush3.msra.mxu0 %v3492_v10  ;;  %2932 = vmatprep.mubr.msk.f32.mxu0 %vm3388_vm0, %v3387_v1 }
 0x91d   :  { %2930 = vmatprep.subr.mxu0 %v3387_v1  ;;  %2937 = vmatprep.subr.mxu1 %v3387_v1 }
 0x91e   :  { %2931 = vmatpush3.msra.mxu0 %v3498_v12  ;;  %2938 = vmatpush3.msra.mxu1 %v3543_v41 }
 0x91f   :  { %2946 = vmatprep.subr.mxu0 %v3387_v1  ;;  %2939 = vmatprep.subr.mxu1 %v3387_v1 }
 0x920   :  { %2940 = vmatpush3.msra.mxu1 %v3547_v42  ;;  %2943 = vmatprep.mubr.msk.f32.mxu1 %vm3388_vm0, %v3387_v1 }
 0x921   :  { %2941 = vmatprep.subr.mxu1 %v3387_v1 }
 0x922   :  { %2942 = vmatpush3.msra.mxu1 %v3551_v43 }
 0x923   :  { %2957 = vmatprep.subr.mxu1 %v3387_v1 }
 0x9d1   :  { %v944_v33 = vpop.f32.mrf.mxu1 }
 0x9d2   :  { %v949_v34 = vrot.slane %v944_v33, 2 }
 0x9d3   :  { %v2901_v36 = vpop.f32.mrf.mxu1 }
 0x9d4   :  { %v951_v37 = vadd.f32 %v949_v34, %v3524_v25 }
 0x9d6   :  { %v2638_v38 = vmul.f32 -1.442695, %v951_v37 }
 0x9d7   :  { %v1051_v39 = vpop.f32.mrf.mxu0 }
 0x9d8   :  { %3147 = vpow2.f32 %v2638_v38 }
 0x9d9   :  { %v2912_v44 = vpop.f32.mrf.mxu0  ;;  %v1121_v45 = vpop.f32.mrf.mxu1 }
 0x9da   :  { %v1122_v47 = vadd.f32 %v1121_v45, %v1051_v39 }
 0x9db   :  { %v2923_v51 = vpop.f32.mrf.mxu1 }
 0x9dc   :  { %v1125_v52 = vadd.f32 %v3598_v58, %v1122_v47 }
 0x9de   :  { %v2641_v53 = vmul.f32 -1.442695, %v1125_v52 }
 0x9e0   :  { %3149 = vpow2.f32 %v2641_v53 }
 0x9e1   :  { %3151 = vtanh.f32 %v951_v37 }
 0x9e5   :  { %v3148_v54 = vpop.eup %3147 }
 0x9e6   :  { %v956_v55 = vadd.f32 1.0, %v3148_v54 }
 0x9e8   :  { %3153 = vrcp.f32 %v956_v55 }
 0x9e9   :  { %3155 = vtanh.f32 %v1125_v52 }
 0x9ed   :  { %v3150_v56 = vpop.eup %3149 }
 0x9ee   :  { %v1130_v57 = vadd.f32 1.0, %v3150_v56  ;;  %v3152_v25 = vpop.eup %3151 }
 0x9f0   :  { %3157 = vrcp.f32 %v1130_v57 }
 0x9f5   :  { %v3154_v59 = vpop.eup %3153 }
 0x9f6   :  { %v959_v60 = vsel %vm3527_vm6, %v3152_v25, %v3154_v59  ;;  %v3156_v61 = vpop.eup %3155 }
 0x9f7   :  { %965 = vrot.lane.b32.xlu0 %v959_v60, %s3389_s1  ;;  %v963_v7 = vmul.f32 %v961_v6, %v959_v60 }
 0x9fd   :  { %v3158_v62 = vpop.eup %3157 }
 0x9fe   :  { %v1133_v63 = vsel %vm3527_vm6, %v3156_v61, %v3158_v62 }
 0x9ff   :  { %1136 = vrot.lane.b32.xlu1 %v1133_v63, %s3389_s1  ;;  %v1134_v13 = vmul.f32 %v1133_v63, %v3671_v20 }
 0xa69   :  { %v966_v0 = vpop.permute.xlu0 %965 }
 0xa6a   :  { %v968_v2 = vmul.f32 %v966_v0, %v959_v60 }
 0xa6c   :  { %970 = vrot.lane.b32.xlu0 %v968_v2, %s3390_s21 }
 0xa71   :  { %v1137_v3 = vpop.permute.xlu1 %1136 }
 0xa72   :  { %v1139_v4 = vmul.f32 %v1137_v3, %v1133_v63 }
 0xa74   :  { %1141 = vrot.lane.b32.xlu1 %v1139_v4, %s3390_s21 }
 0xade   :  { %v971_v9 = vpop.permute.xlu0 %970 }
 0xadf   :  { %v3725_v11 = vadd.f32 %v971_v9, %v963_v7 }
 0xae1   :  { %3159 = vtanh.f32 %v3725_v11  ;;  %v1237_v2 = vrot.slane %v3725_v11, 6 }
 0xae6   :  { %v1142_v14 = vpop.permute.xlu1 %1141 }
 0xae7   :  { %v3729_v15 = vadd.f32 %v1142_v14, %v1134_v13 }
 0xae9   :  { %3161 = vtanh.f32 %v3729_v15 }
 0xaee   :  { %v3160_v16 = vpop.eup %3159 }
 0xaef   :  { %976 = vrot.lane.b32.xlu0 %v3160_v16, %s3389_s1 }
 0xaf6   :  { %v3162_v18 = vpop.eup %3161 }
 0xaf7   :  { %1147 = vrot.lane.b32.xlu1 %v3162_v18, %s3389_s1 }
 0xb61   :  { %v977_v17 = vpop.permute.xlu0 %976 }
 0xb62   :  { %v979_v19 = vmul.f32 %v977_v17, %v959_v60 }
 0xb64   :  { %v1152_v21 = vrot.slane %v979_v19, 6 }
 0xb66   :  { %1153 = vrot.lane.b32.xlu0 %v1152_v21, %s3390_s21 }
 0xb69   :  { %v1148_v22 = vpop.permute.xlu1 %1147 }
 0xb6a   :  { %v1150_v20 = vmul.f32 %v1148_v22, %v1133_v63 }
 0xb6c   :  { %v2442_v26 = vrot.slane %v1150_v20, 4  ;;  %1257 = vrot.lane.b32.xlu1 %v1150_v20, %s3390_s21 }
 0xb6e   :  { %v3740_v29 = vsel %vm2455_vm9, %v2454_v28, %v2442_v26 }
 0xbd8   :  { %v1154_v27 = vpop.permute.xlu0 %1153 }
 0xbd9   :  { %2933 = vmatmul.mubr.msk.f32.vlgmr.msra.gmra.mxu0 %vm214_vm7, %v1154_v27 }
 0xbda   :  { %2947 = vmatpush3.msra.mxu0 %v3567_v46  ;;  %2954 = vmatprep.mubr.msk.f32.mxu0 %vm3388_vm0, %v3387_v1 }
 0xbdb   :  { %2948 = vmatprep.subr.mxu0 %v3387_v1 }
 0xbdc   :  { %2949 = vmatpush3.msra.mxu0 %v3570_v48 }
 0xbdd   :  { %2950 = vmatprep.subr.mxu0 %v3387_v1 }
 0xbde   :  { %2951 = vmatpush3.msra.mxu0 %v3576_v49  ;;  %v1258_v35 = vpop.permute.xlu1 %1257 }
 0xbdf   :  { %2944 = vmatmul.mubr.msk.f32.vlgmr.msra.gmra.mxu1 %vm214_vm7, %v1258_v35  ;;  %2952 = vmatprep.subr.mxu0 %v3387_v1 }
 0xbe0   :  { %2953 = vmatpush3.msra.mxu0 %v3580_v50  ;;  %2958 = vmatpush3.msra.mxu1 %v3476_v5 }
 0xbe1   :  { %2955 = vmatmul.mubr.msk.f32.vlgmr.msra.gmra.mxu0 %vm214_vm7, %v1154_v27  ;;  %2959 = vmatprep.subr.mxu1 %v3387_v1 }
 0xbe2   :  { %2960 = vmatpush3.msra.mxu1 %v3485_v8  ;;  %2965 = vmatprep.mubr.msk.f32.mxu1 %vm3388_vm0, %v3387_v1 }
 0xbe3   :  { %2961 = vmatprep.subr.mxu1 %v3387_v1  ;;  %2968 = vmatprep.subr.mxu0 %v3387_v1 }
 0xbe4   :  { %2962 = vmatpush3.msra.mxu1 %v3492_v10  ;;  %2969 = vmatpush3.msra.mxu0 %v3539_v40 }
 0xbe5   :  { %2963 = vmatprep.subr.mxu1 %v3387_v1  ;;  %2970 = vmatprep.subr.mxu0 %v3387_v1 }
 0xbe6   :  { %2964 = vmatpush3.msra.mxu1 %v3498_v12  ;;  %2971 = vmatpush3.msra.mxu0 %v3543_v41 }
 0xbe7   :  { %2979 = vmatprep.subr.mxu1 %v3387_v1  ;;  %2972 = vmatprep.subr.mxu0 %v3387_v1 }
 0xbe8   :  { %2973 = vmatpush3.msra.mxu0 %v3547_v42  ;;  %2976 = vmatprep.mubr.msk.f32.mxu0 %vm3388_vm0, %v3387_v1 }
 0xbe9   :  { %2974 = vmatprep.subr.mxu0 %v3387_v1 }
 0xbea   :  { %2975 = vmatpush3.msra.mxu0 %v3551_v43 }
 0xbeb   :  { %2990 = vmatprep.subr.mxu0 %v3387_v1 }
 0xc99   :  { %v1223_v31 = vpop.f32.mrf.mxu0 }
 0xc9a   :  { %v1227_v32 = vadd.f32 %v1223_v31, %v3522_v23 }
 0xc9b   :  { %v2934_v33 = vpop.f32.mrf.mxu0 }
 0xc9c   :  { %v2643_v34 = vmul.f32 -1.442695, %v1227_v32 }
 0xc9e   :  { %3163 = vpow2.f32 %v2643_v34 }
 0xc9f   :  { %v1327_v36 = vpop.f32.mrf.mxu1 }
 0xca1   :  { %v2945_v37 = vpop.f32.mrf.mxu1  ;;  %v1397_v38 = vpop.f32.mrf.mxu0 }
 0xca2   :  { %v1398_v39 = vadd.f32 %v1397_v38, %v1327_v36 }
 0xca3   :  { %v2956_v44 = vpop.f32.mrf.mxu0 }
 0xca4   :  { %v1401_v45 = vadd.f32 %v3598_v58, %v1398_v39 }
 0xca6   :  { %v2646_v47 = vmul.f32 -1.442695, %v1401_v45 }
 0xca8   :  { %3165 = vpow2.f32 %v2646_v47 }
 0xca9   :  { %3167 = vtanh.f32 %v1227_v32 }
 0xcab   :  { %v3164_v51 = vpop.eup %3163 }
 0xcac   :  { %v1232_v52 = vadd.f32 1.0, %v3164_v51 }
 0xcae   :  { %3169 = vrcp.f32 %v1232_v52 }
 0xcaf   :  { %3171 = vtanh.f32 %v1401_v45 }
 0xcb5   :  { %v3166_v53 = vpop.eup %3165 }
 0xcb6   :  { %v1406_v54 = vadd.f32 1.0, %v3166_v53  ;;  %v3168_v55 = vpop.eup %3167 }
 0xcb8   :  { %3173 = vrcp.f32 %v1406_v54 }
 0xcbb   :  { %v3170_v56 = vpop.eup %3169 }
 0xcbc   :  { %v1235_v57 = vsel %vm3527_vm6, %v3168_v55, %v3170_v56  ;;  %v3172_v25 = vpop.eup %3171 }
 0xcbd   :  { %1241 = vrot.lane.b32.xlu0 %v1235_v57, %s3389_s1  ;;  %v1239_v3 = vmul.f32 %v1237_v2, %v1235_v57 }
 0xcc5   :  { %v3174_v59 = vpop.eup %3173 }
 0xcc6   :  { %v1409_v60 = vsel %vm3527_vm6, %v3172_v25, %v3174_v59 }
 0xcc7   :  { %1412 = vrot.lane.b32.xlu1 %v1409_v60, %s3389_s1  ;;  %v1410_v7 = vmul.f32 %v1409_v60, %v3729_v15 }
 0xd2f   :  { %v1242_v61 = vpop.permute.xlu0 %1241 }
 0xd30   :  { %v1244_v62 = vmul.f32 %v1242_v61, %v1235_v57 }
 0xd32   :  { %1246 = vrot.lane.b32.xlu0 %v1244_v62, %s3390_s21 }
 0xd39   :  { %v1413_v63 = vpop.permute.xlu1 %1412 }
 0xd3a   :  { %v1415_v0 = vmul.f32 %v1413_v63, %v1409_v60 }
 0xd3c   :  { %1417 = vrot.lane.b32.xlu1 %v1415_v0, %s3390_s21 }
 0xda4   :  { %v1247_v4 = vpop.permute.xlu0 %1246 }
 0xda5   :  { %v3786_v6 = vadd.f32 %v1247_v4, %v1239_v3 }
 0xda7   :  { %3175 = vtanh.f32 %v3786_v6  ;;  %v1515_v56 = vrot.slane %v3786_v6, 6 }
 0xdae   :  { %v1418_v9 = vpop.permute.xlu1 %1417 }
 0xdaf   :  { %v3790_v13 = vadd.f32 %v1418_v9, %v1410_v7 }
 0xdb1   :  { %3177 = vtanh.f32 %v3790_v13 }
 0xdb4   :  { %v3176_v14 = vpop.eup %3175 }
 0xdb5   :  { %1252 = vrot.lane.b32.xlu0 %v3176_v14, %s3389_s1 }
 0xdbe   :  { %v3178_v16 = vpop.eup %3177 }
 0xdbf   :  { %1423 = vrot.lane.b32.xlu1 %v3178_v16, %s3389_s1 }
 0xe27   :  { %v1253_v11 = vpop.permute.xlu0 %1252 }
 0xe28   :  { %v1255_v18 = vmul.f32 %v1253_v11, %v1235_v57 }
 0xe2a   :  { %1428 = vrot.lane.b32.xlu0 %v1255_v18, %s3390_s21 }
 0xe31   :  { %v1424_v17 = vpop.permute.xlu1 %1423 }
 0xe32   :  { %v1426_v19 = vmul.f32 %v1424_v17, %v1409_v60 }
 0xe34   :  { %v2444_v21 = vrot.slane %v1426_v19, 2  ;;  %1535 = vrot.lane.b32.xlu1 %v1426_v19, %s3390_s21 }
 0xe36   :  { %v3799_v15 = vsel %vm2457_vm10, %v3740_v29, %v2444_v21 }
 0xe9c   :  { %v1429_v24 = vpop.permute.xlu0 %1428 }
 0xe9d   :  { %2966 = vmatmul.mubr.msk.f32.vlgmr.msra.gmra.mxu1 %vm214_vm7, %v1429_v24 }
 0xe9e   :  { %2980 = vmatpush3.msra.mxu1 %v3567_v46  ;;  %2987 = vmatprep.mubr.msk.f32.mxu1 %vm3388_vm0, %v3387_v1 }
 0xe9f   :  { %2981 = vmatprep.subr.mxu1 %v3387_v1 }
 0xea0   :  { %2982 = vmatpush3.msra.mxu1 %v3570_v48 }
 0xea1   :  { %2983 = vmatprep.subr.mxu1 %v3387_v1 }
 0xea2   :  { %2984 = vmatpush3.msra.mxu1 %v3576_v49 }
 0xea3   :  { %2985 = vmatprep.subr.mxu1 %v3387_v1 }
 0xea4   :  { %2986 = vmatpush3.msra.mxu1 %v3580_v50 }
 0xea5   :  { %2988 = vmatmul.mubr.msk.f32.vlgmr.msra.gmra.mxu1 %vm214_vm7, %v1429_v24  ;;  %3001 = vmatprep.subr.mxu1 %v3387_v1 }
 0xea6   :  { %v1536_v22 = vpop.permute.xlu1 %1535  ;;  %3002 = vmatpush3.msra.mxu1 %v3539_v40  ;;  %3009 = vmatprep.mubr.msk.f32.mxu1 %vm3388_vm0, %v3387_v1 }
 0xea7   :  { %2977 = vmatmul.mubr.msk.f32.vlgmr.msra.gmra.mxu0 %vm214_vm7, %v1536_v22  ;;  %3003 = vmatprep.subr.mxu1 %v3387_v1 }
 0xea8   :  { %2991 = vmatpush3.msra.mxu0 %v3476_v5  ;;  %2998 = vmatprep.mubr.msk.f32.mxu0 %vm3388_vm0, %v3387_v1 }
 0xea9   :  { %2992 = vmatprep.subr.mxu0 %v3387_v1  ;;  %3004 = vmatpush3.msra.mxu1 %v3543_v41 }
 0xeaa   :  { %2993 = vmatpush3.msra.mxu0 %v3485_v8  ;;  %3005 = vmatprep.subr.mxu1 %v3387_v1 }
 0xeab   :  { %2994 = vmatprep.subr.mxu0 %v3387_v1  ;;  %3006 = vmatpush3.msra.mxu1 %v3547_v42 }
 0xeac   :  { %2995 = vmatpush3.msra.mxu0 %v3492_v10  ;;  %3007 = vmatprep.subr.mxu1 %v3387_v1 }
 0xead   :  { %2996 = vmatprep.subr.mxu0 %v3387_v1  ;;  %3008 = vmatpush3.msra.mxu1 %v3551_v43 }
 0xeae   :  { %2997 = vmatpush3.msra.mxu0 %v3498_v12  ;;  %3023 = vmatprep.subr.mxu1 %v3387_v1 }
 0xeaf   :  { %3012 = vmatprep.subr.mxu0 %v3387_v1 }
 0xf5d   :  { %v1498_v5 = vpop.f32.mrf.mxu1 }
 0xf5e   :  { %v1503_v8 = vrot.slane %v1498_v5, 6 }
 0xf5f   :  { %v2967_v20 = vpop.f32.mrf.mxu1 }
 0xf60   :  { %v1505_v26 = vadd.f32 %v1503_v8, %v3522_v23 }
 0xf62   :  { %v2648_v28 = vmul.f32 -1.442695, %v1505_v26 }
 0xf64   :  { %3179 = vpow2.f32 %v2648_v28 }
 0xf65   :  { %v1675_v10 = vpop.f32.mrf.mxu1 }
 0xf67   :  { %v1605_v29 = vpop.f32.mrf.mxu0  ;;  %v2989_v27 = vpop.f32.mrf.mxu1 }
 0xf68   :  { %v1676_v35 = vadd.f32 %v1675_v10, %v1605_v29 }
 0xf69   :  { %v2978_v31 = vpop.f32.mrf.mxu0 }
 0xf6a   :  { %v1679_v32 = vadd.f32 %v3598_v58, %v1676_v35 }
 0xf6c   :  { %v2651_v33 = vmul.f32 -1.442695, %v1679_v32 }
 0xf6e   :  { %3181 = vpow2.f32 %v2651_v33 }
 0xf6f   :  { %3183 = vtanh.f32 %v1505_v26 }
 0xf71   :  { %v3180_v12 = vpop.eup %3179 }
 0xf72   :  { %v1510_v34 = vadd.f32 1.0, %v3180_v12 }
 0xf74   :  { %3185 = vrcp.f32 %v1510_v34 }
 0xf75   :  { %3187 = vtanh.f32 %v1679_v32 }
 0xf7b   :  { %v3182_v36 = vpop.eup %3181 }
 0xf7c   :  { %v1684_v37 = vadd.f32 1.0, %v3182_v36  ;;  %v3184_v38 = vpop.eup %3183 }
 0xf7e   :  { %3189 = vrcp.f32 %v1684_v37 }
 0xf81   :  { %v3186_v39 = vpop.eup %3185 }
 0xf82   :  { %v1513_v44 = vsel %vm3527_vm6, %v3184_v38, %v3186_v39  ;;  %v3188_v45 = vpop.eup %3187 }
 0xf83   :  { %1519 = vrot.lane.b32.xlu0 %v1513_v44, %s3389_s1  ;;  %v1517_v57 = vmul.f32 %v1515_v56, %v1513_v44 }
 0xf8b   :  { %v3190_v47 = vpop.eup %3189 }
 0xf8c   :  { %v1687_v51 = vsel %vm3527_vm6, %v3188_v45, %v3190_v47 }
 0xf8d   :  { %1690 = vrot.lane.b32.xlu1 %v1687_v51, %s3389_s1  ;;  %v1688_v60 = vmul.f32 %v1687_v51, %v3790_v13 }
 0xff5   :  { %v1520_v52 = vpop.permute.xlu0 %1519 }
 0xff6   :  { %v1522_v53 = vmul.f32 %v1520_v52, %v1513_v44 }
 0xff8   :  { %1524 = vrot.lane.b32.xlu0 %v1522_v53, %s3390_s21 }
 0xfff   :  { %v1691_v54 = vpop.permute.xlu1 %1690 }
0x1000   :  { %v1693_v55 = vmul.f32 %v1691_v54, %v1687_v51 }
0x1002   :  { %1695 = vrot.lane.b32.xlu1 %v1693_v55, %s3390_s21 }
0x106a   :  { %v1525_v25 = vpop.permute.xlu0 %1524 }
0x106b   :  { %v3845_v59 = vadd.f32 %v1525_v25, %v1517_v57  ;;  %v3239_v57 = vld [vmem:[#allocation2 + $0x18] sm:$0xff]  ;;  %v3240_v25 = vld [vmem:[#allocation2 + $0x10] sm:$0xff] }
0x106d   :  { %3191 = vtanh.f32 %v3845_v59  ;;  %v1794_v12 = vrot.slane %v3845_v59, 6  ;;  %v3241_v59 = vld [vmem:[#allocation2 + $0x8] sm:$0xff] }
0x1074   :  { %v1696_v61 = vpop.permute.xlu1 %1695 }
0x1075   :  { %v3849_v62 = vadd.f32 %v1696_v61, %v1688_v60  ;;  %v3242_v61 = vld [vmem:[#allocation2] sm:$0xff] }
0x1077   :  { %3193 = vtanh.f32 %v3849_v62 }
0x107a   :  { %v3192_v63 = vpop.eup %3191 }
0x107b   :  { %1530 = vrot.lane.b32.xlu0 %v3192_v63, %s3389_s1  ;;  %v3244_v63 = vld [vmem:[#allocation5 + $0x30] sm:$0xff] }
0x1084   :  { %v3194_v0 = vpop.eup %3193 }
0x1085   :  { %1701 = vrot.lane.b32.xlu1 %v3194_v0, %s3389_s1  ;;  %v3245_v0 = vld [vmem:[#allocation5 + $0x28] sm:$0xff] }
0x10ed   :  { %v1531_v2 = vpop.permute.xlu0 %1530 }
0x10ee   :  { %v1533_v3 = vmul.f32 %v1531_v2, %v1513_v44  ;;  %v3246_v2 = vld [vmem:[#allocation5 + $0x20] sm:$0xff] }
0x10f0   :  { %v1706_v4 = vrot.slane %v1533_v3, 2 }
0x10f2   :  { %1707 = vrot.lane.b32.xlu0 %v1706_v4, %s3390_s21 }
0x10f7   :  { %v1702_v6 = vpop.permute.xlu1 %1701 }
0x10f8   :  { %v3855_v7 = vmul.f32 %v1702_v6, %v1687_v51 }
0x10fa   :  { %1814 = vrot.lane.b32.xlu1 %v3855_v7, %s3390_s21 }
0x1164   :  { %v1708_v9 = vpop.permute.xlu0 %1707 }
0x1165   :  { %2999 = vmatmul.mubr.msk.f32.vlgmr.msra.gmra.mxu0 %vm214_vm7, %v1708_v9 }
0x1166   :  { %3013 = vmatpush3.msra.mxu0 %v3567_v46  ;;  %3020 = vmatprep.mubr.msk.f32.mxu0 %vm3388_vm0, %v3387_v1  ;;  %v3235_v46 = vld [vmem:[#allocation5 + $0x18] sm:$0xff] }
0x1167   :  { %3014 = vmatprep.subr.mxu0 %v3387_v1 }
0x1168   :  { %3015 = vmatpush3.msra.mxu0 %v3570_v48  ;;  %v3236_v48 = vld [vmem:[#allocation5 + $0x10] sm:$0xff] }
0x1169   :  { %3016 = vmatprep.subr.mxu0 %v3387_v1 }
0x116a   :  { %3017 = vmatpush3.msra.mxu0 %v3576_v49  ;;  %v3237_v49 = vld [vmem:[#allocation5 + $0x8] sm:$0xff] }
0x116b   :  { %3018 = vmatprep.subr.mxu0 %v3387_v1 }
0x116c   :  { %3019 = vmatpush3.msra.mxu0 %v3580_v50  ;;  %v1815_v13 = vpop.permute.xlu1 %1814  ;;  %v3238_v50 = vld [vmem:[#allocation5] sm:$0xff] }
0x116d   :  { %3010 = vmatmul.mubr.msk.f32.vlgmr.msra.gmra.mxu1 %vm214_vm7, %v1815_v13  ;;  %3021 = vmatmul.mubr.msk.f32.vlgmr.msra.gmra.mxu0 %vm214_vm7, %v1708_v9 }
0x116e   :  { %3024 = vmatpush3.msra.mxu1 %v3235_v46  ;;  %3034 = vmatprep.subr.mxu0 %v3387_v1 }
0x116f   :  { %3025 = vmatprep.subr.mxu1 %v3387_v1  ;;  %3035 = vmatpush3.msra.mxu0 %v3539_v40 }
0x1170   :  { %3026 = vmatpush3.msra.mxu1 %v3236_v48  ;;  %3036 = vmatprep.subr.mxu0 %v3387_v1 }
0x1171   :  { %3027 = vmatprep.subr.mxu1 %v3387_v1  ;;  %3031 = vmatprep.mubr.msk.f32.mxu1 %vm3388_vm0, %v3387_v1 }
0x1172   :  { %3028 = vmatpush3.msra.mxu1 %v3237_v49  ;;  %3037 = vmatpush3.msra.mxu0 %v3543_v41 }
0x1173   :  { %3029 = vmatprep.subr.mxu1 %v3387_v1  ;;  %3038 = vmatprep.subr.mxu0 %v3387_v1 }
0x1174   :  { %3030 = vmatpush3.msra.mxu1 %v3238_v50  ;;  %3039 = vmatpush3.msra.mxu0 %v3547_v42 }
0x1175   :  { %3045 = vmatprep.subr.mxu1 %v3387_v1  ;;  %3040 = vmatprep.subr.mxu0 %v3387_v1 }
0x1176   :  { %3041 = vmatpush3.msra.mxu0 %v3551_v43  ;;  %3042 = vmatprep.mubr.msk.f32.mxu0 %vm3388_vm0, %v3387_v1 }
0x1177   :  { %3056 = vmatprep.subr.mxu0 %v3387_v1 }
0x1225   :  { %v1777_v40 = vpop.f32.mrf.mxu0 }
0x1226   :  { %v1782_v41 = vrot.slane %v1777_v40, 4 }
0x1227   :  { %v3000_v14 = vpop.f32.mrf.mxu0 }
0x1228   :  { %v1784_v16 = vadd.f32 %v1782_v41, %v3522_v23  ;;  %v3247_v41 = vld [vmem:[#allocation7 + $0x1] ss:$0 sm:$0xff] }
0x122a   :  { %v2653_v11 = vmul.f32 -1.442695, %v1784_v16 }
0x122c   :  { %3195 = vpow2.f32 %v2653_v11 }
0x122d   :  { %v1884_v18 = vpop.f32.mrf.mxu1  ;;  %v1954_v42 = vpop.f32.mrf.mxu0 }
0x122e   :  { %v1955_v17 = vadd.f32 %v1954_v42, %v1884_v18 }
0x122f   :  { %v3011_v19 = vpop.f32.mrf.mxu1  ;;  %v3022_v21 = vpop.f32.mrf.mxu0 }
0x1230   :  { %v1958_v24 = vadd.f32 %v3598_v58, %v1955_v17 }
0x1232   :  { %v2656_v43 = vmul.f32 -1.442695, %v1958_v24 }
0x1234   :  { %3197 = vpow2.f32 %v2656_v43 }
0x1235   :  { %3199 = vtanh.f32 %v1784_v16 }
0x1239   :  { %v3196_v22 = vpop.eup %3195 }
0x123a   :  { %v1789_v5 = vadd.f32 1.0, %v3196_v22 }
0x123c   :  { %3201 = vrcp.f32 %v1789_v5 }
0x123d   :  { %3203 = vtanh.f32 %v1958_v24 }
0x1241   :  { %v3198_v8 = vpop.eup %3197 }
0x1242   :  { %v1963_v20 = vadd.f32 1.0, %v3198_v8  ;;  %v3200_v26 = vpop.eup %3199 }
0x1244   :  { %3205 = vrcp.f32 %v1963_v20 }
0x1249   :  { %v3202_v28 = vpop.eup %3201 }
0x124a   :  { %v1792_v10 = vsel %vm3527_vm6, %v3200_v26, %v3202_v28  ;;  %v3204_v29 = vpop.eup %3203 }
0x124b   :  { %1798 = vrot.lane.b32.xlu0 %v1792_v10, %s3389_s1  ;;  %v1796_v34 = vmul.f32 %v1794_v12, %v1792_v10 }
0x1251   :  { %v3206_v27 = vpop.eup %3205 }
0x1252   :  { %v1966_v58 = vsel %vm3527_vm6, %v3204_v29, %v3206_v27 }
0x1253   :  { %1969 = vrot.lane.b32.xlu1 %v1966_v58, %s3389_s1  ;;  %v1967_v38 = vmul.f32 %v1966_v58, %v3849_v62  ;;  %v3243_v62 = vld [vmem:[#allocation5 + $0x38] sm:$0xff] }
0x12bd   :  { %v1799_v35 = vpop.permute.xlu0 %1798 }
0x12be   :  { %v1801_v31 = vmul.f32 %v1799_v35, %v1792_v10 }
0x12c0   :  { %1803 = vrot.lane.b32.xlu0 %v1801_v31, %s3390_s21 }
0x12c5   :  { %v1970_v32 = vpop.permute.xlu1 %1969 }
0x12c6   :  { %v1972_v33 = vmul.f32 %v1970_v32, %v1966_v58 }
0x12c8   :  { %1974 = vrot.lane.b32.xlu1 %v1972_v33, %s3390_s21 }
0x1332   :  { %v1804_v36 = vpop.permute.xlu0 %1803 }
0x1333   :  { %v3899_v37 = vadd.f32 %v1804_v36, %v1796_v34 }
0x1335   :  { %3207 = vtanh.f32 %v3899_v37  ;;  %v2073_v26 = vrot.slane %v3899_v37, 6 }
0x133a   :  { %v1975_v39 = vpop.permute.xlu1 %1974 }
0x133b   :  { %v3903_v44 = vadd.f32 %v1975_v39, %v1967_v38 }
0x133d   :  { %3209 = vtanh.f32 %v3903_v44 }
0x1342   :  { %v3208_v45 = vpop.eup %3207 }
0x1343   :  { %1809 = vrot.lane.b32.xlu0 %v3208_v45, %s3389_s1 }
0x134a   :  { %v3210_v47 = vpop.eup %3209 }
0x134b   :  { %1980 = vrot.lane.b32.xlu1 %v3210_v47, %s3389_s1 }
0x13b5   :  { %v1810_v51 = vpop.permute.xlu0 %1809 }
0x13b6   :  { %v1812_v52 = vmul.f32 %v1810_v51, %v1792_v10 }
0x13b8   :  { %v1985_v53 = vrot.slane %v1812_v52, 4 }
0x13ba   :  { %1986 = vrot.lane.b32.xlu0 %v1985_v53, %s3390_s21 }
0x13bd   :  { %v1981_v54 = vpop.permute.xlu1 %1980 }
0x13be   :  { %v3909_v55 = vmul.f32 %v1981_v54, %v1966_v58 }
0x13c0   :  { %2093 = vrot.lane.b32.xlu1 %v3909_v55, %s3390_s21  ;;  %v2446_v36 = vrot.slane %v3909_v55, 6 }
0x142c   :  { %v1987_v56 = vpop.permute.xlu0 %1986 }
0x142d   :  { %3032 = vmatmul.mubr.msk.f32.vlgmr.msra.gmra.mxu1 %vm214_vm7, %v1987_v56 }
0x142e   :  { %3046 = vmatpush3.msra.mxu1 %v3239_v57  ;;  %3053 = vmatprep.mubr.msk.f32.mxu1 %vm3388_vm0, %v3387_v1 }
0x142f   :  { %3047 = vmatprep.subr.mxu1 %v3387_v1 }
0x1430   :  { %3048 = vmatpush3.msra.mxu1 %v3240_v25 }
0x1431   :  { %3049 = vmatprep.subr.mxu1 %v3387_v1 }
0x1432   :  { %3050 = vmatpush3.msra.mxu1 %v3241_v59  ;;  %v2094_v60 = vpop.permute.xlu1 %2093 }
0x1433   :  { %3043 = vmatmul.mubr.msk.f32.vlgmr.msra.gmra.mxu0 %vm214_vm7, %v2094_v60  ;;  %3051 = vmatprep.subr.mxu1 %v3387_v1 }
0x1434   :  { %3052 = vmatpush3.msra.mxu1 %v3242_v61  ;;  %3057 = vmatpush3.msra.mxu0 %v3243_v62 }
0x1435   :  { %3054 = vmatmul.mubr.msk.f32.vlgmr.msra.gmra.mxu1 %vm214_vm7, %v1987_v56  ;;  %3067 = vmatprep.subr.mxu1 %v3387_v1 }
0x1436   :  { %3068 = vmatpush3.msra.mxu1 %v3239_v57  ;;  %3058 = vmatprep.subr.mxu0 %v3387_v1 }
0x1437   :  { %3069 = vmatprep.subr.mxu1 %v3387_v1  ;;  %3075 = vmatprep.mubr.msk.f32.mxu1 %vm3388_vm0, %v3387_v1 }
0x1438   :  { %3070 = vmatpush3.msra.mxu1 %v3240_v25  ;;  %3059 = vmatpush3.msra.mxu0 %v3244_v63 }
0x1439   :  { %3071 = vmatprep.subr.mxu1 %v3387_v1  ;;  %3060 = vmatprep.subr.mxu0 %v3387_v1 }
0x143a   :  { %3072 = vmatpush3.msra.mxu1 %v3241_v59  ;;  %3061 = vmatpush3.msra.mxu0 %v3245_v0 }
0x143b   :  { %3073 = vmatprep.subr.mxu1 %v3387_v1  ;;  %3062 = vmatprep.subr.mxu0 %v3387_v1 }
0x143c   :  { %3074 = vmatpush3.msra.mxu1 %v3242_v61  ;;  %3063 = vmatpush3.msra.mxu0 %v3246_v2 }
0x143d   :  { %3064 = vmatprep.mubr.msk.f32.mxu0 %vm3388_vm0, %v3387_v1 }
0x14ed   :  { %v2056_v3 = vpop.f32.mrf.mxu1 }
0x14ee   :  { %v2061_v4 = vrot.slane %v2056_v3, 2 }
0x14ef   :  { %v3033_v6 = vpop.f32.mrf.mxu1 }
0x14f0   :  { %v2063_v9 = vadd.f32 %v2061_v4, %v3522_v23 }
0x14f2   :  { %v2658_v13 = vmul.f32 -1.442695, %v2063_v9 }
0x14f3   :  { %v2163_v46 = vpop.f32.mrf.mxu0 }
0x14f4   :  { %3211 = vpow2.f32 %v2658_v13  ;;  %v2465_v13 = vld [vmem:[#allocation8 + $0x18] sm:$0xff] }
0x14f5   :  { %v3044_v48 = vpop.f32.mrf.mxu0  ;;  %v2233_v49 = vpop.f32.mrf.mxu1  ;;  %3078 = vmatprep.subr.mxu0 %v2465_v13 }
0x14f6   :  { %v2234_v50 = vadd.f32 %v2233_v49, %v2163_v46  ;;  %v2464_v46 = vld [vmem:[#allocation8 + $0x10] sm:$0xff]  ;;  %v2462_v48 = vld [vmem:[#allocation8] sm:$0xff] }
0x14f7   :  { %v3055_v40 = vpop.f32.mrf.mxu1 }
0x14f8   :  { %v2237_v14 = vadd.f32 %v3247_v41, %v2234_v50 }
0x14fa   :  { %v2661_v16 = vmul.f32 -1.442695, %v2237_v14 }
0x14fc   :  { %3213 = vpow2.f32 %v2661_v16 }
0x14fd   :  { %3215 = vtanh.f32 %v2063_v9 }
0x1501   :  { %v3212_v11 = vpop.eup %3211 }
0x1502   :  { %v2068_v18 = vadd.f32 1.0, %v3212_v11 }
0x1504   :  { %3217 = vrcp.f32 %v2068_v18 }
0x1505   :  { %3219 = vtanh.f32 %v2237_v14 }
0x1509   :  { %v3214_v1 = vpop.eup %3213 }
0x150a   :  { %v2242_v42 = vadd.f32 1.0, %v3214_v1  ;;  %v3216_v23 = vpop.eup %3215 }
0x150c   :  { %3221 = vrcp.f32 %v2242_v42 }
0x1511   :  { %v3218_v17 = vpop.eup %3217 }
0x1512   :  { %v2071_v19 = vsel %vm3527_vm6, %v3216_v23, %v3218_v17  ;;  %v3220_v21 = vpop.eup %3219 }
0x1513   :  { %2077 = vrot.lane.b32.xlu0 %v2071_v19, %s3389_s1  ;;  %v2075_v28 = vmul.f32 %v2073_v26, %v2071_v19 }
0x1519   :  { %v3222_v24 = vpop.eup %3221 }
0x151a   :  { %v2245_v43 = vsel %vm3527_vm6, %v3220_v21, %v3222_v24 }
0x151b   :  { %2248 = vrot.lane.b32.xlu1 %v2245_v43, %s3389_s1  ;;  %v2246_v27 = vmul.f32 %v2245_v43, %v3903_v44  ;;  %v2459_v44 = vsel %vm2453_vm8, %v3855_v7, %v2446_v36 }
0x1585   :  { %v2078_v22 = vpop.permute.xlu0 %2077 }
0x1586   :  { %v2080_v5 = vmul.f32 %v2078_v22, %v2071_v19 }
0x1588   :  { %2082 = vrot.lane.b32.xlu0 %v2080_v5, %s3390_s21 }
0x158d   :  { %v2249_v8 = vpop.permute.xlu1 %2248 }
0x158e   :  { %v2251_v20 = vmul.f32 %v2249_v8, %v2245_v43 }
0x1590   :  { %2253 = vrot.lane.b32.xlu1 %v2251_v20, %s3390_s21 }
0x15fa   :  { %v2083_v10 = vpop.permute.xlu0 %2082 }
0x15fb   :  { %v3942_v29 = vadd.f32 %v2083_v10, %v2075_v28 }
0x15fd   :  { %3223 = vtanh.f32 %v3942_v29 }
0x1602   :  { %v2254_v58 = vpop.permute.xlu1 %2253 }
0x1603   :  { %v2256_v35 = vadd.f32 %v2254_v58, %v2246_v27 }
0x1605   :  { %3225 = vtanh.f32 %v2256_v35 }
0x160a   :  { %v3224_v31 = vpop.eup %3223 }
0x160b   :  { %2088 = vrot.lane.b32.xlu0 %v3224_v31, %s3389_s1 }
0x1612   :  { %v3226_v32 = vpop.eup %3225 }
0x1613   :  { %2259 = vrot.lane.b32.xlu1 %v3226_v32, %s3389_s1 }
0x167d   :  { %v2089_v33 = vpop.permute.xlu0 %2088 }
0x167e   :  { %v2091_v12 = vmul.f32 %v2089_v33, %v2071_v19 }
0x1680   :  { %v2339_v34 = vrot.slane %v2091_v12, 6 }
0x1682   :  { %2340 = vrot.lane.b32.xlu1 %v2339_v34, %s3390_s21 }
0x1685   :  { %v2260_v37 = vpop.permute.xlu1 %2259 }
0x1686   :  { %v2262_v38 = vmul.f32 %v2260_v37, %v2245_v43 }
0x1688   :  { %v2448_v39 = vrot.slane %v2262_v38, 4  ;;  %2264 = vrot.lane.b32.xlu0 %v2262_v38, %s3390_s21 }
0x168a   :  { %v2460_v45 = vsel %vm2455_vm9, %v2459_v44, %v2448_v39 }
0x16f4   :  { %v2341_v47 = vpop.permute.xlu1 %2340 }
0x16f5   :  { %3076 = vmatmul.mubr.msk.f32.vlgmr.msra.gmra.mxu1 %vm214_vm7, %v2341_v47 }
0x16fa   :  { %v2265_v51 = vpop.permute.xlu0 %2264 }
0x16fb   :  { %3065 = vmatmul.mubr.msk.f32.vlgmr.msra.gmra.mxu0 %vm214_vm7, %v2265_v51 }
0x16fc   :  { %3079 = vmatpush3.msra.mxu0 %v2465_v13 }
0x16fd   :  { %3080 = vmatprep.subr.mxu0 %v2464_v46 }
0x16fe   :  { %3081 = vmatpush3.msra.mxu0 %v2464_v46 }
0x17b5   :  { %v2410_v52 = vpop.f32.mrf.mxu1 }
0x17b7   :  { %v3077_v53 = vpop.f32.mrf.mxu1 }
0x17bb   :  { %v2334_v54 = vpop.f32.mrf.mxu0 }
0x17bc   :  { %v2411_v55 = vadd.f32 %v2410_v52, %v2334_v54 }
0x17bd   :  { %v3066_v56 = vpop.f32.mrf.mxu0 }
0x17be   :  { %v2414_v57 = vadd.f32 %v3247_v41, %v2411_v55 }
0x17c0   :  { %v2664_v25 = vmul.f32 -1.442695, %v2414_v57 }
0x17c2   :  { %3227 = vpow2.f32 %v2664_v25 }
0x17c3   :  { %3229 = vtanh.f32 %v2414_v57 }
0x17cf   :  { %v3228_v59 = vpop.eup %3227 }
0x17d0   :  { %v2419_v60 = vadd.f32 1.0, %v3228_v59  ;;  %v3230_v7 = vpop.eup %3229 }
0x17d2   :  { %3231 = vrcp.f32 %v2419_v60 }
0x17df   :  { %v3232_v61 = vpop.eup %3231 }
0x17e0   :  { %v2422_v62 = vsel %vm3527_vm6, %v3230_v7, %v3232_v61 }
0x17e1   :  { %2425 = vrot.lane.b32.xlu0 %v2422_v62, %s3389_s1  ;;  %v2423_v2 = vmul.f32 %v2422_v62, %v2256_v35 }
0x1853   :  { %v2426_v63 = vpop.permute.xlu0 %2425 }
0x1854   :  { %v2428_v0 = vmul.f32 %v2426_v63, %v2422_v62 }
0x1856   :  { %2430 = vrot.lane.b32.xlu1 %v2428_v0, %s3390_s21 }
0x185a   :  { %2475 = vrot.lane.b32.xlu1 %v3799_v15, %s3390_s21  ;;  %v2463_v15 = vld [vmem:[#allocation8 + $0x8] sm:$0xff] }
0x185b   :  { %3082 = vmatprep.subr.mxu0 %v2463_v15 }
0x185c   :  { %3083 = vmatpush3.msra.mxu0 %v2463_v15 }
0x185d   :  { %3084 = vmatprep.subr.mxu0 %v2462_v48 }
0x185e   :  { %2560 = vrot.lane.b32.xlu1 %v2091_v12, %s3390_s21  ;;  %3085 = vmatpush3.msra.mxu0 %v2462_v48 }
0x18c8   :  { %v2431_v3 = vpop.permute.xlu1 %2430 }
0x18c9   :  { %v2433_v4 = vadd.f32 %v2431_v3, %v2423_v2 }
0x18cb   :  { %3233 = vtanh.f32 %v2433_v4 }
0x18cc   :  { %v2476_v6 = vpop.permute.xlu1 %2475 }
0x18cd   :  { %3086 = vmatprep.mubr.msk.f32.mxu0 %vm214_vm7, %v2476_v6 }
0x18d0   :  { %v2561_v30 = vpop.permute.xlu1 %2560 }
0x18d1   :  { %2564 = vst.msk [vmem:[#allocation10 - $0x6] sm:$0xc0] %vm2563_vm11, %v2561_v30 }
0x18d8   :  { %v3234_v9 = vpop.eup %3233 }
0x18d9   :  { %2436 = vrot.lane.b32.xlu0 %v3234_v9, %s3389_s1 }
0x194b   :  { %v2437_v49 = vpop.permute.xlu0 %2436 }
0x194c   :  { %v2439_v50 = vmul.f32 %v2437_v49, %v2422_v62 }
0x194e   :  { %v2451_v40 = vrot.slane %v2439_v50, 2  ;;  %2570 = vrot.lane.b32.xlu1 %v2439_v50, %s3390_s21 }
0x1950   :  { %v2461_v41 = vsel %vm2457_vm10, %v2460_v45, %v2451_v40 }
0x1951   :  { %2477 = vrot.lane.b32.xlu0 %v2461_v41, %s3390_s21 }
0x1955   :  { %2566 = vrot.lane.b32.xlu0 %v3942_v29, %s3391_s22 }
0x1959   :  { %2577 = vrot.lane.b32.xlu0 %v2433_v4, %s3391_s22 }
0x19c0   :  { %v2571_v14 = vpop.permute.xlu1 %2570 }
0x19c1   :  { %2575 = vst.msk [vmem:[#allocation10 + $0x2] sm:$0x3] %vm2574_vm12, %v2571_v14 }
0x19c3   :  { %v2478_v16 = vpop.permute.xlu0 %2477 }
0x19c4   :  { %3087 = vmatmul.mubr.msk.f32.vlgmr.msra.gmra.mxu0 %vm214_vm7, %v2478_v16 }
0x19c7   :  { %v2567_v11 = vpop.permute.xlu0 %2566 }
0x19c8   :  { %2569 = vst.msk [vmem:[#allocation11 - $0x6] sm:$0xc0] %vm2563_vm11, %v2567_v11 }
0x19cb   :  { %v2578_v18 = vpop.permute.xlu0 %2577 }
0x19cc   :  { %2581 = vst.msk [vmem:[#allocation11 + $0x2] sm:$0x3] %vm2574_vm12, %v2578_v18 }
0x19cd   :  { %3339 = shalt.err (!%p3336_p10)
}
0x19ce   :  { %s3394_s27 = smov 2   ;;  %s3348_s29 = scalar_lea.vmem %s2602_s25, 64 }
0x19cf   :  { %2595 = dma.vmem_to_hbm [thread:$0]  %s2590_s3, 64, %s3999_s8, [#allocation4], %s3390_s21, %s3390_s21, %s3394_s27  }
0x19d0   :  { %p3349_p11 = scmp.ne.s32.totalorder %s2602_s25, %s3348_s29  ;;  %p3353_p12 = scmp.lt.s32.totalorder %s2602_s25, %s2602_s25 }
0x19d1   :  { %p3354_p13 = scmp.lt.s32.totalorder %s3348_s29, %s3348_s29 }
0x19d3   :  { %p3355_p0 = por %p3354_p13, %p3353_p12 }
0x19d5   :  { %p3356_p1 = pnand %p3355_p0, %p3349_p11 }
0x19d7   :  { %3359 = shalt.err (!%p3356_p1)
}
0x19d8   :  { %2607 = dma.vmem_to_hbm [thread:$0]  %s2602_s25, 64, %s4000_s9, [#allocation12], %s3390_s21, %s3390_s21, %s3394_s27  }
0x19d9   :  { %v2665_v1 = vld [vmem:[%s3997_s6] ss:$0 sm:$0xff] }
0x1a84   :  { %v3088_v42 = vpop.f32.mrf.mxu0 }
0x1a85   :  { %v2555_v23 = vadd.f32 %v3088_v42, %v2665_v1 }
0x1a86   :  { %v2549_v17 = vpop.f32.mrf.mxu0 }
0x1a87   :  { %2559 = vst [vmem:[%s3998_s7 + $0x8] sm:$0xff] %v2555_v23  ;;  %v2550_v19 = vadd.f32 %v2665_v1, %v2549_v17 }
0x1a89   :  { %2558 = vst [vmem:[%s3998_s7] sm:$0xff] %v2550_v19 }
0x1a8a   :  { %3374 = dma.done.wait [#allocation4], 64  }
0x1a8b   :  { %3375 = vsyncadd [#allocation4], 4294967232 }
0x1a8c   :  { %3376 = dma.done.wait [#allocation12], 64  }
0x1a8d   :  { %3377 = vsyncadd [#allocation12], 4294967232 }
0x1a8e   :  { %2616 = vsyncpa [#allocation3], 1 }
0x1a8f   :  { %2617 = vsyncpa [#allocation6], 1 }
0x1a90   :  { %2618 = vsyncpa [#allocation9], 1 }
0x1a91   :  { %2619 = vsyncpa [#allocation4], 1 }
0x1a92   :  { %2620 = vsyncpa [#allocation12], 1 }

</bundles_post_ra>
